<compile_context>
chip_gen: v5e
topology: v5e:2x2
jax: 0.10.0
libtpu: 0.0.40
codegen_flags: <defaults>
</compile_context>

<pallas_src>
import functools

import jax
import jax.numpy as jnp
from jax.experimental import pallas as pl
from jax.experimental.pallas import tpu as pltpu

INPUT_SIZE = 784
HIDDEN_SIZE = 500
NUM_CLASSES = 10

HIDDEN_PAD = 512   # 500 -> 512 (4 full lane groups)
CLASS_PAD = 128    # 10  -> 128 (one full lane group, unmasked stores)

NEG_BIG = -1e30    # fill for padded class logits (exp -> 0, no NaN)

MAX_TB = 512       # biggest batch tile: ~7-8 MB of buffers, inside every
                   # generation's default scoped-VMEM limit (16/32/32 MiB)


def _round_up(n, m):
    return ((n + m - 1) // m) * m


def _choose_batch_tile(B):
    """Pick a batch tile that is a multiple of 8, capped at MAX_TB, and that
    yields >= 2 grid steps whenever there is enough work to split (so the
    'parallel' batch axis actually shards across v7x's two TensorCores)."""
    Bp8 = _round_up(B, 8)
    if Bp8 <= 8:
        return Bp8
    return min(MAX_TB, _round_up(pl.cdiv(Bp8, 2), 8))


def mlp_kernel(x_ref, w1_ref, b1_ref, w2_ref, b2_ref, o_ref):
    # fc1: [TB, 784](bf16) @ [784, 512](bf16) -> f32 accumulate on the MXU.
    h = jnp.dot(x_ref[...], w1_ref[...], preferred_element_type=jnp.float32)
    # bias + ReLU in f32.
    h = jnp.maximum(h + b1_ref[...], 0.0)
    # fc2: [TB, 512] @ [512, 128] -> f32 accumulate.
    logits = jnp.dot(h.astype(jnp.bfloat16), w2_ref[...],
                     preferred_element_type=jnp.float32)
    # Padded class lanes carry a -1e30 bias -> they vanish in the softmax.
    logits = logits + b2_ref[...]
    # Softmax over classes (PyTorch nn.Softmax() on 2-D input -> dim=1), f32.
    m = jnp.max(logits, axis=-1, keepdims=True)
    e = jnp.exp(logits - m)
    denom = jnp.sum(e, axis=-1, keepdims=True)
    o_ref[...] = e * pl.reciprocal(denom, approx=True)


@jax.jit
def mlp_forward_padded(x_bf16, w1p, b1p, w2p, b2p):
    """x_bf16: [B, 784] bf16 (producer-side cast).  Returns padded [Bp, 128] f32
    softmax probabilities; rows >= B and class lanes >= 10 are padding."""
    B = x_bf16.shape[0]
    TB = _choose_batch_tile(B)
    Bp = _round_up(B, TB)
    if Bp != B:
        x_bf16 = jnp.pad(x_bf16, ((0, Bp - B), (0, 0)))
    grid = (Bp // TB,)

    flops = 2 * Bp * (INPUT_SIZE * HIDDEN_PAD + HIDDEN_PAD * CLASS_PAD)
    bytes_accessed = (
        Bp * INPUT_SIZE * 2                      # x (bf16)
        + INPUT_SIZE * HIDDEN_PAD * 2            # W1 (bf16, DMA'd once)
        + HIDDEN_PAD * 4                         # b1 (f32)
        + HIDDEN_PAD * CLASS_PAD * 2             # W2 (bf16)
        + CLASS_PAD * 4                          # b2 (f32)
        + Bp * CLASS_PAD * 4                     # out (f32)
    )
    transcendentals = Bp * CLASS_PAD + Bp        # exp + approx reciprocal

    return pl.pallas_call(
        mlp_kernel,
        out_shape=jax.ShapeDtypeStruct((Bp, CLASS_PAD), jnp.float32),
        grid=grid,
        in_specs=[
            pl.BlockSpec((TB, INPUT_SIZE), lambda i: (i, 0)),           # x tile (bf16)
            pl.BlockSpec((INPUT_SIZE, HIDDEN_PAD), lambda i: (0, 0)),   # W1 resident
            pl.BlockSpec((1, HIDDEN_PAD), lambda i: (0, 0)),            # b1 resident
            pl.BlockSpec((HIDDEN_PAD, CLASS_PAD), lambda i: (0, 0)),    # W2 resident
            pl.BlockSpec((1, CLASS_PAD), lambda i: (0, 0)),             # b2 resident
        ],
        out_specs=pl.BlockSpec((TB, CLASS_PAD), lambda i: (i, 0)),
        compiler_params=pltpu.CompilerParams(
            dimension_semantics=("parallel",),
        ),
        cost_estimate=pl.CostEstimate(
            flops=flops,
            transcendentals=transcendentals,
            bytes_accessed=bytes_accessed,
        ),
    )(x_bf16, w1p, b1p, w2p, b2p)


def mlp_forward(x_bf16, w1p, b1p, w2p, b2p):
    """Convenience wrapper matching the PyTorch module's [B, 10] output.
    Bandwidth-sensitive consumers should use mlp_forward_padded() directly and
    mask padding themselves (the slice here is an extra HBM pass)."""
    B = x_bf16.shape[0]
    return mlp_forward_padded(x_bf16, w1p, b1p, w2p, b2p)[:B, :NUM_CLASSES]


def init_params(key):
    # Deterministic init mimicking nn.Linear's uniform(-1/sqrt(fan_in), 1/sqrt(fan_in)).
    # Weights are stored [in_features, out_features] (transposed from PyTorch).
    k1, k2, k3, k4 = jax.random.split(key, 4)
    bound1 = 1.0 / jnp.sqrt(INPUT_SIZE)
    bound2 = 1.0 / jnp.sqrt(HIDDEN_SIZE)
    w1 = jax.random.uniform(k1, (INPUT_SIZE, HIDDEN_SIZE), jnp.float32, -bound1, bound1)
    b1 = jax.random.uniform(k2, (1, HIDDEN_SIZE), jnp.float32, -bound1, bound1)
    w2 = jax.random.uniform(k3, (HIDDEN_SIZE, NUM_CLASSES), jnp.float32, -bound2, bound2)
    b2 = jax.random.uniform(k4, (1, NUM_CLASSES), jnp.float32, -bound2, bound2)
    return w1, b1, w2, b2


def prepare_params(w1, b1, w2, b2):
    """Pad to MXU/lane-friendly shapes and cast weights to bf16.

    Hidden 500 -> 512 zero-padded (inert through ReLU and fc2).
    Classes 10 -> 128; padded class lanes get bias = -1e30 so softmax ignores them.
    """
    w1p = (jnp.zeros((INPUT_SIZE, HIDDEN_PAD), jnp.bfloat16)
           .at[:, :HIDDEN_SIZE].set(w1.astype(jnp.bfloat16)))
    b1p = (jnp.zeros((1, HIDDEN_PAD), jnp.float32)
           .at[:, :HIDDEN_SIZE].set(b1))
    w2p = (jnp.zeros((HIDDEN_PAD, CLASS_PAD), jnp.bfloat16)
           .at[:HIDDEN_SIZE, :NUM_CLASSES].set(w2.astype(jnp.bfloat16)))
    b2p = (jnp.full((1, CLASS_PAD), NEG_BIG, jnp.float32)
           .at[:, :NUM_CLASSES].set(b2))
    return w1p, b1p, w2p, b2p


def _reference(x_bf16, w1, b1, w2, b2):
    # Mirrors the kernel numerics: bf16 matmul inputs, f32 accumulate / epilogue.
    x_f = x_bf16.astype(jnp.float32)
    w1_f = w1.astype(jnp.bfloat16).astype(jnp.float32)
    h = jnp.maximum(x_f @ w1_f + b1, 0.0)
    h_f = h.astype(jnp.bfloat16).astype(jnp.float32)
    w2_f = w2.astype(jnp.bfloat16).astype(jnp.float32)
    logits = h_f @ w2_f + b2
    return jax.nn.softmax(logits, axis=-1)


if __name__ == "__main__":
    key = jax.random.PRNGKey(0)
    kx, kp = jax.random.split(key)
    w1, b1, w2, b2 = init_params(kp)
    w1p, b1p, w2p, b2p = prepare_params(w1, b1, w2, b2)

    # Case 1: small batch (single tile, grid=(1,)).
    B1 = 8
    x1 = jax.random.normal(kx, (B1, INPUT_SIZE), dtype=jnp.float32).astype(jnp.bfloat16)
    out1 = jax.block_until_ready(mlp_forward(x1, w1p, b1p, w2p, b2p))
    ref1 = _reference(x1, w1, b1, w2, b2)
    assert out1.shape == (B1, NUM_CLASSES)
    assert bool(jnp.all(jnp.isfinite(out1)))
    assert jnp.allclose(out1, ref1, atol=2e-2, rtol=0.0), float(jnp.max(jnp.abs(out1 - ref1)))
    assert jnp.allclose(jnp.sum(out1, axis=-1), 1.0, atol=1e-2)

    # Case 2: batch that exercises multi-step grid (2 tiles, TC sharding) + row padding.
    B2 = 40
    x2 = jax.random.normal(jax.random.PRNGKey(1), (B2, INPUT_SIZE),
                           dtype=jnp.float32).astype(jnp.bfloat16)
    out2_padded = jax.block_until_ready(mlp_forward_padded(x2, w1p, b1p, w2p, b2p))
    out2 = out2_padded[:B2, :NUM_CLASSES]
    ref2 = _reference(x2, w1, b1, w2, b2)
    assert out2_padded.shape[1] == CLASS_PAD
    assert bool(jnp.all(jnp.isfinite(out2)))
    assert jnp.allclose(out2, ref2, atol=2e-2, rtol=0.0), float(jnp.max(jnp.abs(out2 - ref2)))
    assert jnp.allclose(jnp.sum(out2, axis=-1), 1.0, atol=1e-2)

    print("KERNEL_OK")
</pallas_src>

<mosaic_0001>
module attributes {stable_mosaic.version = 11 : i64} {
  func.func @mlp_kernel(%arg0: i32, %arg1: memref<8x784xbf16, #tpu.memory_space<vmem>>, %arg2: memref<784x512xbf16, #tpu.memory_space<vmem>>, %arg3: memref<1x512xf32, #tpu.memory_space<vmem>>, %arg4: memref<512x128xbf16, #tpu.memory_space<vmem>>, %arg5: memref<1x128xf32, #tpu.memory_space<vmem>>, %arg6: memref<8x128xf32, #tpu.memory_space<vmem>>) attributes {dimension_semantics = [#tpu.dimension_semantics<parallel>], iteration_bounds = array<i64: 1>, scalar_prefetch = 0 : i64, scratch_operands = 0 : i64, tpu.core_type = #tpu.core_type<tc>, window_params = [{transform_indices = @transform_0, window_bounds = array<i64: 8, 784>}, {pipeline_mode = #tpu.pipeline_mode<synchronous>, transform_indices = @transform_1, window_bounds = array<i64: 784, 512>}, {pipeline_mode = #tpu.pipeline_mode<synchronous>, transform_indices = @transform_2, window_bounds = array<i64: 1, 512>}, {pipeline_mode = #tpu.pipeline_mode<synchronous>, transform_indices = @transform_3, window_bounds = array<i64: 512, 128>}, {pipeline_mode = #tpu.pipeline_mode<synchronous>, transform_indices = @transform_4, window_bounds = array<i64: 1, 128>}, {transform_indices = @transform_5, window_bounds = array<i64: 8, 128>}]} {
    %c0 = arith.constant 0 : index
    %c0_0 = arith.constant 0 : index
    %0 = vector.load %arg1[%c0, %c0_0] : memref<8x784xbf16, #tpu.memory_space<vmem>>, vector<8x784xbf16>
    %c0_1 = arith.constant 0 : index
    %c0_2 = arith.constant 0 : index
    %1 = vector.load %arg2[%c0_1, %c0_2] : memref<784x512xbf16, #tpu.memory_space<vmem>>, vector<784x512xbf16>
    %cst = arith.constant dense<0.000000e+00> : vector<8x512xf32>
    %2 = tpu.matmul %0, %1, %cst {dimension_numbers = #tpu.dot_dimension_numbers<[1], [0], [0], [1], [0, 0, 1, 1], [], []>} : vector<8x784xbf16>, vector<784x512xbf16>, vector<8x512xf32> -> vector<8x512xf32>
    %c0_3 = arith.constant 0 : index
    %c0_4 = arith.constant 0 : index
    %3 = vector.load %arg3[%c0_3, %c0_4] : memref<1x512xf32, #tpu.memory_space<vmem>>, vector<1x512xf32>
    %4 = vector.broadcast %3 : vector<1x512xf32> to vector<8x512xf32>
    %5 = arith.addf %2, %4 : vector<8x512xf32>
    %cst_5 = arith.constant 0.000000e+00 : f32
    %6 = vector.broadcast %cst_5 : f32 to vector<8x512xf32>
    %7 = arith.maximumf %5, %6 : vector<8x512xf32>
    %8 = arith.truncf %7 : vector<8x512xf32> to vector<8x512xbf16>
    %c0_6 = arith.constant 0 : index
    %c0_7 = arith.constant 0 : index
    %9 = vector.load %arg4[%c0_6, %c0_7] : memref<512x128xbf16, #tpu.memory_space<vmem>>, vector<512x128xbf16>
    %cst_8 = arith.constant dense<0.000000e+00> : vector<8x128xf32>
    %10 = tpu.matmul %8, %9, %cst_8 {dimension_numbers = #tpu.dot_dimension_numbers<[1], [0], [0], [1], [0, 0, 1, 1], [], []>} : vector<8x512xbf16>, vector<512x128xbf16>, vector<8x128xf32> -> vector<8x128xf32>
    %c0_9 = arith.constant 0 : index
    %c0_10 = arith.constant 0 : index
    %11 = vector.load %arg5[%c0_9, %c0_10] : memref<1x128xf32, #tpu.memory_space<vmem>>, vector<1x128xf32>
    %12 = vector.broadcast %11 : vector<1x128xf32> to vector<8x128xf32>
    %13 = arith.addf %10, %12 : vector<8x128xf32>
    %cst_11 = arith.constant dense<0xFF800000> : vector<8xf32>
    %14 = vector.multi_reduction <maximumf>, %13, %cst_11 [1] : vector<8x128xf32> to vector<8xf32>
    %15 = vector.shape_cast %14 : vector<8xf32> to vector<8x1xf32>
    %16 = vector.broadcast %15 : vector<8x1xf32> to vector<8x128xf32>
    %17 = arith.subf %13, %16 : vector<8x128xf32>
    %18 = math.exp %17 : vector<8x128xf32>
    %cst_12 = arith.constant dense<0.000000e+00> : vector<8xf32>
    %19 = vector.multi_reduction <add>, %18, %cst_12 [1] : vector<8x128xf32> to vector<8xf32>
    %20 = vector.shape_cast %19 : vector<8xf32> to vector<8x1xf32>
    %21 = tpu.reciprocal %20 {approx = true} : vector<8x1xf32> -> vector<8x1xf32>
    %22 = vector.broadcast %21 : vector<8x1xf32> to vector<8x128xf32>
    %23 = arith.mulf %18, %22 : vector<8x128xf32>
    %c0_13 = arith.constant 0 : index
    %c0_14 = arith.constant 0 : index
    %24 = vector.load %arg6[%c0_13, %c0_14] : memref<8x128xf32, #tpu.memory_space<vmem>>, vector<8x128xf32>
    tpu.vector_store %arg6[%c0_13, %c0_14], %23 {strides = array<i32>} : memref<8x128xf32, #tpu.memory_space<vmem>>, vector<8x128xf32>,
    return
  }
  func.func @transform_0(%arg0: i32) -> (i32, i32) {
    %c0_i32 = arith.constant 0 : i32
    %c0_i32_0 = arith.constant 0 : i32
    return %arg0, %c0_i32 : i32, i32
  }
  func.func @transform_1(%arg0: i32) -> (i32, i32) {
    %c0_i32 = arith.constant 0 : i32
    %c0_i32_0 = arith.constant 0 : i32
    %c0_i32_1 = arith.constant 0 : i32
    return %c0_i32, %c0_i32_0 : i32, i32
  }
  func.func @transform_2(%arg0: i32) -> (i32, i32) {
    %c0_i32 = arith.constant 0 : i32
    %c0_i32_0 = arith.constant 0 : i32
    %c0_i32_1 = arith.constant 0 : i32
    return %c0_i32, %c0_i32_0 : i32, i32
  }
  func.func @transform_3(%arg0: i32) -> (i32, i32) {
    %c0_i32 = arith.constant 0 : i32
    %c0_i32_0 = arith.constant 0 : i32
    %c0_i32_1 = arith.constant 0 : i32
    return %c0_i32, %c0_i32_0 : i32, i32
  }
  func.func @transform_4(%arg0: i32) -> (i32, i32) {
    %c0_i32 = arith.constant 0 : i32
    %c0_i32_0 = arith.constant 0 : i32
    %c0_i32_1 = arith.constant 0 : i32
    return %c0_i32, %c0_i32_0 : i32, i32
  }
  func.func @transform_5(%arg0: i32) -> (i32, i32) {
    %c0_i32 = arith.constant 0 : i32
    %c0_i32_0 = arith.constant 0 : i32
    return %arg0, %c0_i32 : i32, i32
  }
}

</mosaic_0001>

<bundles_post_ra>
// kernel: mlp_forward_padded.1
= control target key start
LH: loop header
LB: loop body
LE: loop exit
PB: predicated region body
PF: predicated region fallthrough
CT: control target
= control target key end

     0   :  { %10 = vsyncpa [#allocation3], 0  ;;  %s3419_s0 = inlined_call_operand.hbm [shape: bf16[8,784], index: 0, kind: input, shape index: {}]   ;;  %s3420_s1 = inlined_call_operand.hbm [shape: bf16[784,512], index: 1, kind: input, shape index: {}]   ;;  %s3421_s2 = inlined_call_operand.hbm [shape: f32[1,512], index: 2, kind: input, shape index: {}]   ;;  %s3422_s3 = inlined_call_operand.hbm [shape: bf16[512,128], index: 3, kind: input, shape index: {}]   ;;  %s3423_s4 = inlined_call_operand.vmem [shape: f32[1,128], index: 4, kind: input, shape index: {}]   ;;  %s3424_s5 = inlined_call_operand.hbm [shape: f32[8,128], index: 5, kind: output, shape index: {}]  }
   0x1   :  { %11 = vsyncpa [#allocation6], 0 }
   0x2   :  { %12 = vsyncpa [#allocation9], 0  ;;  %s29_s20 = sshll.u32 %s3420_s1, 4  ;;  %s30_s20 = int_to_ptr.hbm [resolvable:$true] %s29_s20 }
   0x3   :  { %13 = vsyncpa [#allocation4], 0  ;;  %s3298_s21 = smov [#allocation5]   ;;  %s19_s25 = sshll.u32 %s3419_s0, 4  ;;  %s20_s25 = int_to_ptr.hbm [resolvable:$true] %s19_s25 }
   0x4   :  { %s31_s22 = sshll.u32 %s3298_s21, 4  ;;  %s3299_s26 = smov 256   ;;  %s32_s22 = int_to_ptr.vmem [resolvable:$true] %s31_s22 }
   0x5   :  { %s3300_s27 = smov 16   ;;  %s3301_s28 = smov [#allocation2]  }
   0x6   :  { %37 = dma.hbm_to_vmem [thread:$0]  %s30_s20, 25088, %s32_s22, [#allocation6], %s3299_s26, %s3299_s26, %s3300_s27  }
   0x7   :  { %s21_s29 = sshll.u32 %s3301_s28, 4  ;;  %s43_s7 = sshll.u32 %s3421_s2, 4  ;;  %s22_s29 = int_to_ptr.vmem [resolvable:$true] %s21_s29  ;;  %s44_s7 = int_to_ptr.hbm [resolvable:$true] %s43_s7 }
   0x8   :  { %24 = dma.hbm_to_vmem [thread:$0]  %s20_s25, 448, %s22_s29, [#allocation3]  }
   0x9   :  { %s53_s9 = sshll.u32 %s3422_s3, 4  ;;  %s3302_s10 = smov [#allocation7]   ;;  %s54_s9 = int_to_ptr.hbm [resolvable:$true] %s53_s9 }
   0xa   :  { %s45_s11 = sshll.u32 %s3302_s10, 4  ;;  %s3303_s0 = smov [#allocation8]   ;;  %s46_s11 = int_to_ptr.vmem [resolvable:$true] %s45_s11 }
   0xb   :  { %48 = dma.hbm_to_vmem [thread:$0]  %s44_s7, 64, %s46_s11, [#allocation6]  }
   0xc   :  { %s55_s12 = sshll.u32 %s3303_s0, 4  ;;  %s3304_s13 = smov 64   ;;  %s56_s12 = int_to_ptr.vmem [resolvable:$true] %s55_s12 }
   0xd   :  { %s3305_s14 = smov 4  }
   0xe   :  { %61 = dma.hbm_to_vmem [thread:$0]  %s54_s9, 4096, %s56_s12, [#allocation9], %s3304_s13, %s3304_s13, %s3305_s14  }
   0xf   :  { %3290 = dma.done.wait [#allocation3], 448  }
  0x10   :  { %3291 = vsyncadd [#allocation3], 4294966848 }
  0x11   :  { %3292 = dma.done.wait [#allocation6], 25152  }
  0x12   :  { %3293 = vsyncadd [#allocation6], 4294942144 }
  0x13   :  { %3294 = dma.done.wait [#allocation9], 4096  }
  0x14   :  { %3295 = vsyncadd [#allocation9], 4294963200  ;;  %v2126_v0 = vld [vmem:[#allocation5 + $0xe0] sm:$0xf]  ;;  %v2958_v1 = vld [vmem:[#allocation5 + $0xec] sm:$0xf0] }
  0x15   :  { %v2254_v2 = vld [vmem:[#allocation5 + $0x1e0] sm:$0xf]  ;;  %v2127_v3 = vor.u32 %v2958_v1, %v2126_v0  ;;  %v2990_v4 = vld [vmem:[#allocation5 + $0x1ec] sm:$0xf0]  ;;  %vm1295_vm0 = vcmask 130048   ;;  %s2000_s18 = sshll.u32 %s3424_s5, 4  ;;  %s2001_s18 = int_to_ptr.hbm [resolvable:$true] %s2000_s18 }
  0x16   :  { %v2382_v5 = vld [vmem:[#allocation5 + $0x2e0] sm:$0xf]  ;;  %v3022_v6 = vld [vmem:[#allocation5 + $0x2ec] sm:$0xf0]  ;;  %v2255_v7 = vor.u32 %v2990_v4, %v2254_v2 }
  0x17   :  { %v2383_v8 = vor.u32 %v3022_v6, %v2382_v5  ;;  %v2510_v9 = vld [vmem:[#allocation5 + $0x3e0] sm:$0xf]  ;;  %v3054_v10 = vld [vmem:[#allocation5 + $0x3ec] sm:$0xf0]  ;;  %1299 = vmatpush.bf16.msra.mxu0 %v2127_v3 }
  0x18   :  { %v2110_v11 = vld [vmem:[#allocation5 + $0xc0] sm:$0xf]  ;;  %v2511_v12 = vor.u32 %v3054_v10, %v2510_v9  ;;  %v2954_v13 = vld [vmem:[#allocation5 + $0xcc] sm:$0xf0]  ;;  %1312 = vmatpush.bf16.msra.mxu1 %v2255_v7 }
  0x19   :  { %v2238_v14 = vld [vmem:[#allocation5 + $0x1c0] sm:$0xf]  ;;  %v2986_v15 = vld [vmem:[#allocation5 + $0x1cc] sm:$0xf0]  ;;  %1325 = vmatpush.bf16.msra.mxu2 %v2383_v8  ;;  %v2111_v16 = vor.u32 %v2954_v13, %v2110_v11 }
  0x1a   :  { %v2239_v17 = vor.u32 %v2986_v15, %v2238_v14  ;;  %v2366_v18 = vld [vmem:[#allocation5 + $0x2c0] sm:$0xf]  ;;  %v3018_v19 = vld [vmem:[#allocation5 + $0x2cc] sm:$0xf0]  ;;  %1338 = vmatpush.bf16.msra.mxu3 %v2511_v12 }
  0x1b   :  { %v2494_v20 = vld [vmem:[#allocation5 + $0x3c0] sm:$0xf]  ;;  %v2367_v21 = vor.u32 %v3018_v19, %v2366_v18  ;;  %v3050_v22 = vld [vmem:[#allocation5 + $0x3cc] sm:$0xf0]  ;;  %1300 = vmatpush.bf16.msra.mxu0 %v2111_v16 }
  0x1c   :  { %v2094_v23 = vld [vmem:[#allocation5 + $0xa0] sm:$0xf]  ;;  %v2950_v24 = vld [vmem:[#allocation5 + $0xac] sm:$0xf0]  ;;  %v2495_v25 = vor.u32 %v3050_v22, %v2494_v20  ;;  %1313 = vmatpush.bf16.msra.mxu1 %v2239_v17 }
  0x1d   :  { %v2222_v26 = vld [vmem:[#allocation5 + $0x1a0] sm:$0xf]  ;;  %v2982_v27 = vld [vmem:[#allocation5 + $0x1ac] sm:$0xf0]  ;;  %v2095_v29 = vor.u32 %v2950_v24, %v2094_v23  ;;  %1326 = vmatpush.bf16.msra.mxu2 %v2367_v21 }
  0x1e   :  { %v2350_v28 = vld [vmem:[#allocation5 + $0x2a0] sm:$0xf]  ;;  %v3014_v30 = vld [vmem:[#allocation5 + $0x2ac] sm:$0xf0]  ;;  %v2223_v33 = vor.u32 %v2982_v27, %v2222_v26  ;;  %1339 = vmatpush.bf16.msra.mxu3 %v2495_v25 }
  0x1f   :  { %v2478_v31 = vld [vmem:[#allocation5 + $0x3a0] sm:$0xf]  ;;  %v3046_v32 = vld [vmem:[#allocation5 + $0x3ac] sm:$0xf0]  ;;  %v2351_v34 = vor.u32 %v3014_v30, %v2350_v28  ;;  %1301 = vmatpush.bf16.msra.mxu0 %v2095_v29 }
  0x20   :  { %v2078_v35 = vld [vmem:[#allocation5 + $0x80] sm:$0xf]  ;;  %v2946_v36 = vld [vmem:[#allocation5 + $0x8c] sm:$0xf0]  ;;  %v2479_v38 = vor.u32 %v3046_v32, %v2478_v31  ;;  %1314 = vmatpush.bf16.msra.mxu1 %v2223_v33 }
  0x21   :  { %v2206_v37 = vld [vmem:[#allocation5 + $0x180] sm:$0xf]  ;;  %v2978_v39 = vld [vmem:[#allocation5 + $0x18c] sm:$0xf0]  ;;  %v2079_v44 = vor.u32 %v2946_v36, %v2078_v35  ;;  %1327 = vmatpush.bf16.msra.mxu2 %v2351_v34  ;;  %v2956_v34 = vld [vmem:[#allocation5 + $0xe4] sm:$0xf] }
  0x22   :  { %v2334_v40 = vld [vmem:[#allocation5 + $0x280] sm:$0xf]  ;;  %v3010_v41 = vld [vmem:[#allocation5 + $0x28c] sm:$0xf0]  ;;  %v2207_v45 = vor.u32 %v2978_v39, %v2206_v37  ;;  %1340 = vmatpush.bf16.msra.mxu3 %v2479_v38  ;;  %v2128_v35 = vld [vmem:[#allocation5 + $0xf0] sm:$0xf0] }
  0x23   :  { %v2462_v42 = vld [vmem:[#allocation5 + $0x380] sm:$0xf]  ;;  %v3042_v43 = vld [vmem:[#allocation5 + $0x38c] sm:$0xf0]  ;;  %v2335_v46 = vor.u32 %v3010_v41, %v2334_v40  ;;  %1302 = vmatpush.bf16.msra.mxu0 %v2079_v44  ;;  %v81_v37 = vld [vmem:[#allocation2] sm:$0xff] }
  0x24   :  { %v2062_v47 = vld [vmem:[#allocation5 + $0x60] sm:$0xf]  ;;  %v2942_v48 = vld [vmem:[#allocation5 + $0x6c] sm:$0xf0]  ;;  %v2463_v50 = vor.u32 %v3042_v43, %v2462_v42  ;;  %1315 = vmatpush.bf16.msra.mxu1 %v2207_v45  ;;  %v295_v41 = vunpack.c.l.b16 %v81_v37 }
  0x25   :  { %v2190_v49 = vld [vmem:[#allocation5 + $0x160] sm:$0xf]  ;;  %v2974_v51 = vld [vmem:[#allocation5 + $0x16c] sm:$0xf0]  ;;  %v2063_v56 = vor.u32 %v2942_v48, %v2062_v47  ;;  %1328 = vmatpush.bf16.msra.mxu2 %v2335_v46  ;;  %v2988_v46 = vld [vmem:[#allocation5 + $0x1e4] sm:$0xf] }
  0x26   :  { %v2318_v52 = vld [vmem:[#allocation5 + $0x260] sm:$0xf]  ;;  %v3006_v53 = vld [vmem:[#allocation5 + $0x26c] sm:$0xf0]  ;;  %v2191_v57 = vor.u32 %v2974_v51, %v2190_v49  ;;  %1341 = vmatpush.bf16.msra.mxu3 %v2463_v50  ;;  %v2256_v47 = vld [vmem:[#allocation5 + $0x1f0] sm:$0xf0]  ;;  %v2131_v49 = vor.u32 %v2956_v34, %v2128_v35 }
  0x27   :  { %v2446_v54 = vld [vmem:[#allocation5 + $0x360] sm:$0xf]  ;;  %v3038_v55 = vld [vmem:[#allocation5 + $0x36c] sm:$0xf0]  ;;  %v2319_v58 = vor.u32 %v3006_v53, %v2318_v52  ;;  %1303 = vmatpush.bf16.msra.mxu0 %v2063_v56  ;;  %v2112_v56 = vld [vmem:[#allocation5 + $0xd0] sm:$0xf0] }
  0x28   :  { %v2046_v59 = vld [vmem:[#allocation5 + $0x40] sm:$0xf]  ;;  %v2938_v60 = vld [vmem:[#allocation5 + $0x4c] sm:$0xf0]  ;;  %v2447_v62 = vor.u32 %v3038_v55, %v2446_v54  ;;  %1316 = vmatpush.bf16.msra.mxu1 %v2191_v57  ;;  %v2952_v55 = vld [vmem:[#allocation5 + $0xc4] sm:$0xf]  ;;  %v3351_v57 = vpack.c.b16 %v295_v41, %v295_v41 }
  0x29   :  { %v2174_v61 = vld [vmem:[#allocation5 + $0x140] sm:$0xf]  ;;  %v2970_v63 = vld [vmem:[#allocation5 + $0x14c] sm:$0xf0]  ;;  %v2047_v4 = vor.u32 %v2938_v60, %v2046_v59  ;;  %1329 = vmatpush.bf16.msra.mxu2 %v2319_v58  ;;  %v296_v58 = vunpack.c.h.b16 %v81_v37  ;;  %v2064_v34 = vld [vmem:[#allocation5 + $0x70] sm:$0xf0] }
  0x2a   :  { %v2302_v0 = vld [vmem:[#allocation5 + $0x240] sm:$0xf]  ;;  %v3002_v1 = vld [vmem:[#allocation5 + $0x24c] sm:$0xf0]  ;;  %v2175_v5 = vor.u32 %v2970_v63, %v2174_v61  ;;  %1342 = vmatpush.bf16.msra.mxu3 %v2447_v62  ;;  %v2259_v61 = vor.u32 %v2988_v46, %v2256_v47  ;;  %v2984_v63 = vld [vmem:[#allocation5 + $0x1c4] sm:$0xf] }
  0x2b   :  { %v2430_v2 = vld [vmem:[#allocation5 + $0x340] sm:$0xf]  ;;  %v3034_v3 = vld [vmem:[#allocation5 + $0x34c] sm:$0xf0]  ;;  %v2303_v6 = vor.u32 %v3002_v1, %v2302_v0  ;;  %1304 = vmatpush.bf16.msra.mxu0 %v2047_v4  ;;  %v2240_v0 = vld [vmem:[#allocation5 + $0x1d0] sm:$0xf0] }
  0x2c   :  { %v2030_v7 = vld [vmem:[#allocation5 + $0x20] sm:$0xf]  ;;  %v2934_v8 = vld [vmem:[#allocation5 + $0x2c] sm:$0xf0]  ;;  %v2431_v10 = vor.u32 %v3034_v3, %v2430_v2  ;;  %1317 = vmatpush.bf16.msra.mxu1 %v2175_v5  ;;  %v2115_v2 = vor.u32 %v2952_v55, %v2112_v56  ;;  %v2936_v46 = vld [vmem:[#allocation5 + $0x44] sm:$0xf] }
  0x2d   :  { %v2158_v9 = vld [vmem:[#allocation5 + $0x120] sm:$0xf]  ;;  %v2966_v11 = vld [vmem:[#allocation5 + $0x12c] sm:$0xf0]  ;;  %v2031_v17 = vor.u32 %v2934_v8, %v2030_v7  ;;  %1330 = vmatpush.bf16.msra.mxu2 %v2303_v6  ;;  %v2948_v7 = vld [vmem:[#allocation5 + $0xa4] sm:$0xf] }
  0x2e   :  { %v2286_v12 = vld [vmem:[#allocation5 + $0x220] sm:$0xf]  ;;  %v2998_v13 = vld [vmem:[#allocation5 + $0x22c] sm:$0xf0]  ;;  %v2159_v21 = vor.u32 %v2966_v11, %v2158_v9  ;;  %1343 = vmatpush.bf16.msra.mxu3 %v2431_v10  ;;  %v2096_v8 = vld [vmem:[#allocation5 + $0xb0] sm:$0xf0]  ;;  %v3357_v9 = vpack.c.b16 %v296_v58, %v296_v58  ;;  %v2243_v10 = vor.u32 %v2984_v63, %v2240_v0 }
  0x2f   :  { %v2414_v14 = vld [vmem:[#allocation5 + $0x320] sm:$0xf]  ;;  %v3030_v15 = vld [vmem:[#allocation5 + $0x32c] sm:$0xf0]  ;;  %v2287_v22 = vor.u32 %v2998_v13, %v2286_v12  ;;  %1305 = vmatpush.bf16.msra.mxu0 %v2031_v17  ;;  %v2980_v12 = vld [vmem:[#allocation5 + $0x1a4] sm:$0xf] }
  0x30   :  { %v2014_v16 = vld [vmem:[#allocation5] sm:$0xf]  ;;  %v2930_v18 = vld [vmem:[#allocation5 + $0xc] sm:$0xf0]  ;;  %v2415_v26 = vor.u32 %v3030_v15, %v2414_v14  ;;  %1318 = vmatpush.bf16.msra.mxu1 %v2159_v21  ;;  %v2224_v13 = vld [vmem:[#allocation5 + $0x1b0] sm:$0xf0]  ;;  %v2099_v15 = vor.u32 %v2948_v7, %v2096_v8 }
  0x31   :  { %v2142_v19 = vld [vmem:[#allocation5 + $0x100] sm:$0xf]  ;;  %v2962_v20 = vld [vmem:[#allocation5 + $0x10c] sm:$0xf0]  ;;  %v2015_v33 = vor.u32 %v2930_v18, %v2014_v16  ;;  %1331 = vmatpush.bf16.msra.mxu2 %v2287_v22  ;;  %v2080_v21 = vld [vmem:[#allocation5 + $0x90] sm:$0xf0] }
  0x32   :  { %v2270_v23 = vld [vmem:[#allocation5 + $0x200] sm:$0xf]  ;;  %v2994_v24 = vld [vmem:[#allocation5 + $0x20c] sm:$0xf0]  ;;  %v2143_v38 = vor.u32 %v2962_v20, %v2142_v19  ;;  %1344 = vmatpush.bf16.msra.mxu3 %v2415_v26  ;;  %v2944_v20 = vld [vmem:[#allocation5 + $0x84] sm:$0xf] }
  0x33   :  { %v82_v25 = vld [vmem:[#allocation2 + $0x8] sm:$0xff]  ;;  %v2398_v27 = vld [vmem:[#allocation5 + $0x300] sm:$0xf]  ;;  %v2271_v39 = vor.u32 %v2994_v24, %v2270_v23  ;;  %1306 = vmatpush.bf16.msra.mxu0 %v2015_v33  ;;  %v84_v22 = vld [vmem:[#allocation2 + $0x18] sm:$0xf]  ;;  %v2227_v23 = vor.u32 %v2980_v12, %v2224_v13 }
  0x34   :  { %v3026_v28 = vld [vmem:[#allocation5 + $0x30c] sm:$0xf0]  ;;  %v2638_v29 = vld [vmem:[#allocation5 + $0x4e0] sm:$0xf]  ;;  %v297_v36 = vunpack.c.l.b16 %v82_v25  ;;  %v298_v42 = vunpack.c.h.b16 %v82_v25  ;;  %1319 = vmatpush.bf16.msra.mxu1 %v2143_v38  ;;  %v2976_v25 = vld [vmem:[#allocation5 + $0x184] sm:$0xf]  ;;  %v301_v35 = vunpack.c.l.b16 %v84_v22 }
  0x35   :  { %v3086_v30 = vld [vmem:[#allocation5 + $0x4ec] sm:$0xf0]  ;;  %v2766_v31 = vld [vmem:[#allocation5 + $0x5e0] sm:$0xf]  ;;  %v2399_v43 = vor.u32 %v3026_v28, %v2398_v27  ;;  %1332 = vmatpush.bf16.msra.mxu2 %v2271_v39  ;;  %v2208_v26 = vld [vmem:[#allocation5 + $0x190] sm:$0xf0]  ;;  %v2083_v28 = vor.u32 %v2944_v20, %v2080_v21 }
  0x36   :  { %v3118_v32 = vld [vmem:[#allocation5 + $0x5ec] sm:$0xf0]  ;;  %v2782_v40 = vld [vmem:[#allocation5 + $0x600] sm:$0xf]  ;;  %v2639_v44 = vor.u32 %v3086_v30, %v2638_v29  ;;  %v3349_v53 = vpack.c.b16 %v297_v36, %v297_v36  ;;  %v3353_v60 = vpack.c.b16 %v298_v42, %v298_v42  ;;  %1307 = vmatmul.bf16.vlgmr.msra.gmra.mxu0 %v3351_v57  ;;  %v2940_v33 = vld [vmem:[#allocation5 + $0x64] sm:$0xf]  ;;  %v2211_v36 = vor.u32 %v2976_v25, %v2208_v26 }
  0x37   :  { %v3122_v45 = vld [vmem:[#allocation5 + $0x60c] sm:$0xf0]  ;;  %v2767_v48 = vor.u32 %v3118_v32, %v2766_v31  ;;  %v2622_v50 = vld [vmem:[#allocation5 + $0x4c0] sm:$0xf]  ;;  %1345 = vmatpush.bf16.msra.mxu3 %v2399_v43  ;;  %1320 = vmatmul.bf16.vlgmr.msra.gmra.mxu1 %v3357_v9  ;;  %v2972_v38 = vld [vmem:[#allocation5 + $0x164] sm:$0xf]  ;;  %v2067_v41 = vor.u32 %v2940_v33, %v2064_v34 }
  0x38   :  { %v3082_v51 = vld [vmem:[#allocation5 + $0x4cc] sm:$0xf0]  ;;  %v2750_v52 = vld [vmem:[#allocation5 + $0x5c0] sm:$0xf]  ;;  %v2783_v59 = vor.u32 %v3122_v45, %v2782_v40  ;;  %1351 = vmatpush.bf16.msrb.mxu0 %v2639_v44  ;;  %1333 = vmatmul.bf16.vlgmr.msra.gmra.mxu2 %v3349_v53  ;;  %v2192_v39 = vld [vmem:[#allocation5 + $0x170] sm:$0xf0] }
  0x39   :  { %v3114_v54 = vld [vmem:[#allocation5 + $0x5cc] sm:$0xf0]  ;;  %v2623_v62 = vor.u32 %v3082_v51, %v2622_v50  ;;  %1364 = vmatpush.bf16.msrb.mxu1 %v2767_v48  ;;  %v2606_v3 = vld [vmem:[#allocation5 + $0x4a0] sm:$0xf]  ;;  %v2048_v47 = vld [vmem:[#allocation5 + $0x50] sm:$0xf0]  ;;  %v3361_v48 = vpack.c.b16 %v301_v35, %v301_v35 }
  0x3a   :  { %v2751_v1 = vor.u32 %v3114_v54, %v2750_v52  ;;  %v3078_v4 = vld [vmem:[#allocation5 + $0x4ac] sm:$0xf0]  ;;  %v2734_v5 = vld [vmem:[#allocation5 + $0x5a0] sm:$0xf]  ;;  %1384 = vmatpush.bf16.msrb.mxu2 %v2783_v59  ;;  %1346 = vmatmul.bf16.vlgmr.msra.gmra.mxu3 %v3353_v60  ;;  %v2968_v51 = vld [vmem:[#allocation5 + $0x144] sm:$0xf]  ;;  %v2051_v55 = vor.u32 %v2936_v46, %v2048_v47 }
  0x3b   :  { %1390 = vmatpush.bf16.msrb.mxu3 %v2131_v49  ;;  %v3110_v6 = vld [vmem:[#allocation5 + $0x5ac] sm:$0xf0]  ;;  %v2607_v11 = vor.u32 %v3078_v4, %v2606_v3  ;;  %v2590_v16 = vld [vmem:[#allocation5 + $0x480] sm:$0xf]  ;;  %v2195_v49 = vor.u32 %v2972_v38, %v2192_v39  ;;  %v2176_v52 = vld [vmem:[#allocation5 + $0x150] sm:$0xf0] }
  0x3c   :  { %1352 = vmatpush.bf16.msrb.mxu0 %v2623_v62  ;;  %v2735_v14 = vor.u32 %v3110_v6, %v2734_v5  ;;  %v3074_v17 = vld [vmem:[#allocation5 + $0x48c] sm:$0xf0]  ;;  %v2718_v18 = vld [vmem:[#allocation5 + $0x580] sm:$0xf]  ;;  %v2932_v62 = vld [vmem:[#allocation5 + $0x24] sm:$0xf] }
  0x3d   :  { %1365 = vmatpush.bf16.msrb.mxu1 %v2751_v1  ;;  %v3106_v19 = vld [vmem:[#allocation5 + $0x58c] sm:$0xf0]  ;;  %v2591_v24 = vor.u32 %v3074_v17, %v2590_v16  ;;  %v2574_v29 = vld [vmem:[#allocation5 + $0x460] sm:$0xf]  ;;  %v2032_v63 = vld [vmem:[#allocation5 + $0x30] sm:$0xf0]  ;;  %v2179_v1 = vor.u32 %v2968_v51, %v2176_v52 }
  0x3e   :  { %1403 = vmatpush.bf16.msra.mxu2 %v2259_v61  ;;  %v2719_v27 = vor.u32 %v3106_v19, %v2718_v18  ;;  %v3070_v30 = vld [vmem:[#allocation5 + $0x46c] sm:$0xf0]  ;;  %v2702_v31 = vld [vmem:[#allocation5 + $0x560] sm:$0xf]  ;;  %v2964_v0 = vld [vmem:[#allocation5 + $0x124] sm:$0xf]  ;;  %v2035_v7 = vor.u32 %v2932_v62, %v2032_v63 }
  0x3f   :  { %1391 = vmatpush.bf16.msrb.mxu3 %v2115_v2  ;;  %v3102_v32 = vld [vmem:[#allocation5 + $0x56c] sm:$0xf0]  ;;  %v2575_v37 = vor.u32 %v3070_v30, %v2574_v29  ;;  %v2558_v42 = vld [vmem:[#allocation5 + $0x440] sm:$0xf]  ;;  %v2160_v3 = vld [vmem:[#allocation5 + $0x130] sm:$0xf0] }
  0x40   :  { %1353 = vmatpush.bf16.msrb.mxu0 %v2607_v11  ;;  %v2703_v40 = vor.u32 %v3102_v32, %v2702_v31  ;;  %v3066_v43 = vld [vmem:[#allocation5 + $0x44c] sm:$0xf0]  ;;  %v2686_v44 = vld [vmem:[#allocation5 + $0x540] sm:$0xf]  ;;  %v83_v5 = vld [vmem:[#allocation2 + $0x10] sm:$0xff]  ;;  %v2163_v19 = vor.u32 %v2964_v0, %v2160_v3 }
  0x41   :  { %1366 = vmatpush.bf16.msrb.mxu1 %v2735_v14  ;;  %v3098_v45 = vld [vmem:[#allocation5 + $0x54c] sm:$0xf0]  ;;  %v2559_v50 = vor.u32 %v3066_v43, %v2558_v42  ;;  %v2542_v56 = vld [vmem:[#allocation5 + $0x420] sm:$0xf]  ;;  %v2928_v12 = vld [vmem:[#allocation5 + $0x4] sm:$0xf]  ;;  %v299_v18 = vunpack.c.l.b16 %v83_v5 }
  0x42   :  { %1404 = vmatpush.bf16.msra.mxu2 %v2243_v10  ;;  %v2687_v54 = vor.u32 %v3098_v45, %v2686_v44  ;;  %v3062_v58 = vld [vmem:[#allocation5 + $0x42c] sm:$0xf0]  ;;  %v2670_v59 = vld [vmem:[#allocation5 + $0x520] sm:$0xf]  ;;  %v2016_v13 = vld [vmem:[#allocation5 + $0x10] sm:$0xf0] }
  0x43   :  { %1392 = vmatpush.bf16.msrb.mxu3 %v2099_v15  ;;  %v3094_v61 = vld [vmem:[#allocation5 + $0x52c] sm:$0xf0]  ;;  %v2543_v2 = vor.u32 %v3062_v58, %v2542_v56  ;;  %v2526_v4 = vld [vmem:[#allocation5 + $0x400] sm:$0xf]  ;;  %v3020_v14 = vld [vmem:[#allocation5 + $0x2e4] sm:$0xf]  ;;  %v2019_v25 = vor.u32 %v2928_v12, %v2016_v13  ;;  %v3365_v34 = vpack.c.b16 %v299_v18, %v299_v18 }
  0x44   :  { %1354 = vmatpush.bf16.msrb.mxu0 %v2591_v24  ;;  %v2671_v6 = vor.u32 %v3094_v61, %v2670_v59  ;;  %v3058_v8 = vld [vmem:[#allocation5 + $0x40c] sm:$0xf0]  ;;  %v2654_v10 = vld [vmem:[#allocation5 + $0x500] sm:$0xf]  ;;  %v2384_v15 = vld [vmem:[#allocation5 + $0x2f0] sm:$0xf0] }
  0x45   :  { %1367 = vmatpush.bf16.msrb.mxu1 %v2719_v27  ;;  %v3090_v11 = vld [vmem:[#allocation5 + $0x50c] sm:$0xf0]  ;;  %v3052_v16 = vld [vmem:[#allocation5 + $0x3e4] sm:$0xf]  ;;  %v2512_v17 = vld [vmem:[#allocation5 + $0x3f0] sm:$0xf0]  ;;  %v2527_v20 = vor.u32 %v3058_v8, %v2526_v4 }
  0x46   :  { %1405 = vmatpush.bf16.msra.mxu2 %v2227_v23  ;;  %v3084_v21 = vld [vmem:[#allocation5 + $0x4e4] sm:$0xf]  ;;  %v2640_v22 = vld [vmem:[#allocation5 + $0x4f0] sm:$0xf0]  ;;  %v300_v23 = vunpack.c.h.b16 %v83_v5  ;;  %v2655_v24 = vor.u32 %v3090_v11, %v2654_v10  ;;  %v2515_v29 = vor.u32 %v3052_v16, %v2512_v17 }
  0x47   :  { %1393 = vmatpush.bf16.msrb.mxu3 %v2083_v28  ;;  %v2960_v26 = vld [vmem:[#allocation5 + $0x104] sm:$0xf]  ;;  %v2144_v27 = vld [vmem:[#allocation5 + $0x110] sm:$0xf0]  ;;  %v2387_v28 = vor.u32 %v3020_v14, %v2384_v15  ;;  %v2643_v33 = vor.u32 %v3084_v21, %v2640_v22 }
  0x48   :  { %1355 = vmatpush.bf16.msrb.mxu0 %v2575_v37  ;;  %2796 = vmatmul.msk.bf16.vlgmr.msrb.gmra.mxu2 %vm1295_vm0, %v3361_v48  ;;  %v3116_v30 = vld [vmem:[#allocation5 + $0x5e4] sm:$0xf]  ;;  %v2768_v31 = vld [vmem:[#allocation5 + $0x5f0] sm:$0xf0]  ;;  %v2147_v38 = vor.u32 %v2960_v26, %v2144_v27  ;;  %v3367_v39 = vpack.c.b16 %v300_v23, %v300_v23 }
  0x49   :  { %1368 = vmatpush.bf16.msrb.mxu1 %v2703_v40  ;;  %v3016_v32 = vld [vmem:[#allocation5 + $0x2c4] sm:$0xf]  ;;  %v2368_v35 = vld [vmem:[#allocation5 + $0x2d0] sm:$0xf0]  ;;  %v2771_v42 = vor.u32 %v3116_v30, %v2768_v31 }
  0x4a   :  { %1406 = vmatpush.bf16.msra.mxu2 %v2211_v36  ;;  %v3048_v36 = vld [vmem:[#allocation5 + $0x3c4] sm:$0xf]  ;;  %v2496_v37 = vld [vmem:[#allocation5 + $0x3d0] sm:$0xf0]  ;;  %v2371_v43 = vor.u32 %v3016_v32, %v2368_v35 }
  0x4b   :  { %1394 = vmatpush.bf16.msrb.mxu3 %v2067_v41  ;;  %v3080_v40 = vld [vmem:[#allocation5 + $0x4c4] sm:$0xf]  ;;  %v2624_v41 = vld [vmem:[#allocation5 + $0x4d0] sm:$0xf0]  ;;  %v2499_v44 = vor.u32 %v3048_v36, %v2496_v37 }
  0x4c   :  { %1356 = vmatpush.bf16.msrb.mxu0 %v2559_v50  ;;  %v3112_v45 = vld [vmem:[#allocation5 + $0x5c4] sm:$0xf]  ;;  %v2752_v46 = vld [vmem:[#allocation5 + $0x5d0] sm:$0xf0] }
  0x4d   :  { %1369 = vmatpush.bf16.msrb.mxu1 %v2687_v54  ;;  %v3012_v47 = vld [vmem:[#allocation5 + $0x2a4] sm:$0xf]  ;;  %v2352_v50 = vld [vmem:[#allocation5 + $0x2b0] sm:$0xf0]  ;;  %v2755_v56 = vor.u32 %v3112_v45, %v2752_v46 }
  0x4e   :  { %1407 = vmatpush.bf16.msra.mxu2 %v2195_v49  ;;  %v2627_v49 = vor.u32 %v3080_v40, %v2624_v41  ;;  %v3044_v51 = vld [vmem:[#allocation5 + $0x3a4] sm:$0xf]  ;;  %v2480_v52 = vld [vmem:[#allocation5 + $0x3b0] sm:$0xf0]  ;;  %v2355_v58 = vor.u32 %v3012_v47, %v2352_v50 }
  0x4f   :  { %1395 = vmatpush.bf16.msrb.mxu3 %v2051_v55  ;;  %v3076_v54 = vld [vmem:[#allocation5 + $0x4a4] sm:$0xf]  ;;  %v2608_v55 = vld [vmem:[#allocation5 + $0x4b0] sm:$0xf0]  ;;  %v2483_v59 = vor.u32 %v3044_v51, %v2480_v52 }
  0x50   :  { %1357 = vmatpush.bf16.msrb.mxu0 %v2543_v2  ;;  %v3108_v61 = vld [vmem:[#allocation5 + $0x5a4] sm:$0xf]  ;;  %v2736_v62 = vld [vmem:[#allocation5 + $0x5b0] sm:$0xf0]  ;;  %v2611_v0 = vor.u32 %v3076_v54, %v2608_v55 }
  0x51   :  { %1370 = vmatpush.bf16.msrb.mxu1 %v2671_v6  ;;  %v3008_v63 = vld [vmem:[#allocation5 + $0x284] sm:$0xf]  ;;  %v2464_v3 = vld [vmem:[#allocation5 + $0x390] sm:$0xf0]  ;;  %v2739_v6 = vor.u32 %v3108_v61, %v2736_v62  ;;  %v2134_v61 = vld [vmem:[#allocation5 + $0xe8] sm:$0xf] }
  0x52   :  { %1408 = vmatpush.bf16.msra.mxu2 %v2179_v1  ;;  %v2336_v1 = vld [vmem:[#allocation5 + $0x290] sm:$0xf0]  ;;  %v3040_v2 = vld [vmem:[#allocation5 + $0x384] sm:$0xf]  ;;  %v2959_v62 = vld [vmem:[#allocation5 + $0xf4] sm:$0xf0] }
  0x53   :  { %1396 = vmatpush.bf16.msrb.mxu3 %v2035_v7  ;;  %v3072_v4 = vld [vmem:[#allocation5 + $0x484] sm:$0xf]  ;;  %v2592_v5 = vld [vmem:[#allocation5 + $0x490] sm:$0xf0]  ;;  %v2339_v7 = vor.u32 %v3008_v63, %v2336_v1  ;;  %v2467_v8 = vor.u32 %v3040_v2, %v2464_v3  ;;  %v2390_v2 = vld [vmem:[#allocation5 + $0x2e8] sm:$0xf] }
  0x54   :  { %1358 = vmatpush.bf16.msrb.mxu0 %v2527_v20  ;;  %v3104_v10 = vld [vmem:[#allocation5 + $0x584] sm:$0xf]  ;;  %v2720_v11 = vld [vmem:[#allocation5 + $0x590] sm:$0xf0]  ;;  %v2595_v13 = vor.u32 %v3072_v4, %v2592_v5  ;;  %v3023_v3 = vld [vmem:[#allocation5 + $0x2f4] sm:$0xf0] }
  0x55   :  { %1371 = vmatpush.bf16.msrb.mxu1 %v2655_v24  ;;  %v3004_v12 = vld [vmem:[#allocation5 + $0x264] sm:$0xf]  ;;  %v2320_v14 = vld [vmem:[#allocation5 + $0x270] sm:$0xf0] }
  0x56   :  { %1409 = vmatpush.bf16.msra.mxu2 %v2163_v19  ;;  %v3036_v15 = vld [vmem:[#allocation5 + $0x364] sm:$0xf]  ;;  %v2448_v16 = vld [vmem:[#allocation5 + $0x370] sm:$0xf0]  ;;  %v2723_v19 = vor.u32 %v3104_v10, %v2720_v11  ;;  %v2323_v20 = vor.u32 %v3004_v12, %v2320_v14  ;;  %v2135_v10 = vor.u32 %v2959_v62, %v2134_v61  ;;  %v2518_v11 = vld [vmem:[#allocation5 + $0x3e8] sm:$0xf] }
  0x57   :  { %1397 = vmatpush.bf16.msrb.mxu3 %v2019_v25  ;;  %1359 = vmatmul.bf16.vlgmr.msrb.gmra.mxu0 %v3365_v34  ;;  %v3068_v17 = vld [vmem:[#allocation5 + $0x464] sm:$0xf]  ;;  %v2576_v18 = vld [vmem:[#allocation5 + $0x470] sm:$0xf0]  ;;  %v2451_v21 = vor.u32 %v3036_v15, %v2448_v16  ;;  %v3055_v12 = vld [vmem:[#allocation5 + $0x3f4] sm:$0xf0]  ;;  %v2391_v16 = vor.u32 %v3023_v3, %v2390_v2 }
  0x58   :  { %1416 = vmatpush.bf16.msra.mxu0 %v2387_v28  ;;  %1372 = vmatmul.bf16.vlgmr.msrb.gmra.mxu1 %v3367_v39  ;;  %v3100_v22 = vld [vmem:[#allocation5 + $0x564] sm:$0xf]  ;;  %v2704_v23 = vld [vmem:[#allocation5 + $0x570] sm:$0xf0]  ;;  %v2579_v25 = vor.u32 %v3068_v17, %v2576_v18  ;;  %v2262_v14 = vld [vmem:[#allocation5 + $0x1e8] sm:$0xf] }
  0x59   :  { %1429 = vmatpush.bf16.msra.mxu1 %v2515_v29  ;;  %v3000_v24 = vld [vmem:[#allocation5 + $0x244] sm:$0xf]  ;;  %v2304_v26 = vld [vmem:[#allocation5 + $0x250] sm:$0xf0]  ;;  %v2707_v31 = vor.u32 %v3100_v22, %v2704_v23  ;;  %v2991_v15 = vld [vmem:[#allocation5 + $0x1f4] sm:$0xf0] }
  0x5a   :  { %1410 = vmatpush.bf16.msra.mxu2 %v2147_v38  ;;  %1398 = vmatmul.bf16.vlgmr.msrb.gmra.mxu3 %v3351_v57  ;;  %v3032_v27 = vld [vmem:[#allocation5 + $0x344] sm:$0xf]  ;;  %v2432_v28 = vld [vmem:[#allocation5 + $0x350] sm:$0xf0]  ;;  %v2118_v18 = vld [vmem:[#allocation5 + $0xc8] sm:$0xf]  ;;  %v2263_v23 = vor.u32 %v2991_v15, %v2262_v14 }
  0x5b   :  { %1442 = vmatpush.bf16.msra.mxu3 %v2643_v33  ;;  %v3064_v29 = vld [vmem:[#allocation5 + $0x444] sm:$0xf]  ;;  %v2560_v30 = vld [vmem:[#allocation5 + $0x450] sm:$0xf0]  ;;  %v2307_v33 = vor.u32 %v3000_v24, %v2304_v26  ;;  %v2435_v35 = vor.u32 %v3032_v27, %v2432_v28  ;;  %v3019_v22 = vld [vmem:[#allocation5 + $0x2d4] sm:$0xf0] }
  0x5c   :  { %1417 = vmatpush.bf16.msra.mxu0 %v2371_v43  ;;  %v3096_v32 = vld [vmem:[#allocation5 + $0x544] sm:$0xf]  ;;  %v2688_v36 = vld [vmem:[#allocation5 + $0x550] sm:$0xf0]  ;;  %v2563_v40 = vor.u32 %v3064_v29, %v2560_v30  ;;  %v2502_v24 = vld [vmem:[#allocation5 + $0x3c8] sm:$0xf] }
  0x5d   :  { %1430 = vmatpush.bf16.msra.mxu1 %v2499_v44  ;;  %1411 = vmatmul.bf16.vlgmr.msra.gmra.mxu2 %v3357_v9  ;;  %v2996_v37 = vld [vmem:[#allocation5 + $0x224] sm:$0xf]  ;;  %v2288_v38 = vld [vmem:[#allocation5 + $0x230] sm:$0xf0]  ;;  %v2691_v45 = vor.u32 %v3096_v32, %v2688_v36  ;;  %v2246_v27 = vld [vmem:[#allocation5 + $0x1c8] sm:$0xf] }
  0x5e   :  { %1455 = vmatpush.bf16.msrb.mxu2 %v2771_v42  ;;  %v3028_v41 = vld [vmem:[#allocation5 + $0x324] sm:$0xf]  ;;  %v2416_v42 = vld [vmem:[#allocation5 + $0x330] sm:$0xf0]  ;;  %v2987_v28 = vld [vmem:[#allocation5 + $0x1d4] sm:$0xf0] }
  0x5f   :  { %1443 = vmatpush.bf16.msra.mxu3 %v2627_v49  ;;  %v3060_v43 = vld [vmem:[#allocation5 + $0x424] sm:$0xf]  ;;  %v2544_v44 = vld [vmem:[#allocation5 + $0x430] sm:$0xf0]  ;;  %v2291_v49 = vor.u32 %v2996_v37, %v2288_v38  ;;  %v2419_v50 = vor.u32 %v3028_v41, %v2416_v42  ;;  %v2102_v30 = vld [vmem:[#allocation5 + $0xa8] sm:$0xf]  ;;  %v2247_v36 = vor.u32 %v2987_v28, %v2246_v27 }
  0x60   :  { %1418 = vmatpush.bf16.msra.mxu0 %v2355_v58  ;;  %v3092_v46 = vld [vmem:[#allocation5 + $0x524] sm:$0xf]  ;;  %v2672_v47 = vld [vmem:[#allocation5 + $0x530] sm:$0xf0]  ;;  %v2547_v55 = vor.u32 %v3060_v43, %v2544_v44  ;;  %v2486_v37 = vld [vmem:[#allocation5 + $0x3a8] sm:$0xf] }
  0x61   :  { %1431 = vmatpush.bf16.msra.mxu1 %v2483_v59  ;;  %v2992_v51 = vld [vmem:[#allocation5 + $0x204] sm:$0xf]  ;;  %v2272_v52 = vld [vmem:[#allocation5 + $0x210] sm:$0xf0]  ;;  %v3047_v38 = vld [vmem:[#allocation5 + $0x3b4] sm:$0xf0] }
  0x62   :  { %1456 = vmatpush.bf16.msrb.mxu2 %v2755_v56  ;;  %v3024_v54 = vld [vmem:[#allocation5 + $0x304] sm:$0xf]  ;;  %v2400_v56 = vld [vmem:[#allocation5 + $0x310] sm:$0xf0]  ;;  %v2275_v4 = vor.u32 %v2992_v51, %v2272_v52  ;;  %v2230_v41 = vld [vmem:[#allocation5 + $0x1a8] sm:$0xf] }
  0x63   :  { %1444 = vmatpush.bf16.msra.mxu3 %v2611_v0  ;;  %v3056_v58 = vld [vmem:[#allocation5 + $0x404] sm:$0xf]  ;;  %v2528_v59 = vld [vmem:[#allocation5 + $0x410] sm:$0xf0]  ;;  %v2675_v0 = vor.u32 %v3092_v46, %v2672_v47  ;;  %v2403_v5 = vor.u32 %v3024_v54, %v2400_v56  ;;  %v2983_v42 = vld [vmem:[#allocation5 + $0x1b4] sm:$0xf0]  ;;  %v2487_v46 = vor.u32 %v3047_v38, %v2486_v37 }
  0x64   :  { %1419 = vmatpush.bf16.msra.mxu0 %v2339_v7  ;;  %v3120_v63 = vld [vmem:[#allocation5 + $0x604] sm:$0xf]  ;;  %v2784_v1 = vld [vmem:[#allocation5 + $0x610] sm:$0xf0]  ;;  %v2086_v44 = vld [vmem:[#allocation5 + $0x88] sm:$0xf] }
  0x65   :  { %1432 = vmatpush.bf16.msra.mxu1 %v2467_v8  ;;  %v2656_v7 = vld [vmem:[#allocation5 + $0x510] sm:$0xf0]  ;;  %v2531_v8 = vor.u32 %v3056_v58, %v2528_v59  ;;  %v2342_v47 = vld [vmem:[#allocation5 + $0x288] sm:$0xf]  ;;  %v3043_v52 = vld [vmem:[#allocation5 + $0x394] sm:$0xf0] }
  0x66   :  { %1457 = vmatpush.bf16.msrb.mxu2 %v2739_v6  ;;  %v3088_v6 = vld [vmem:[#allocation5 + $0x504] sm:$0xf]  ;;  %v2470_v51 = vld [vmem:[#allocation5 + $0x388] sm:$0xf]  ;;  %v2979_v56 = vld [vmem:[#allocation5 + $0x194] sm:$0xf0] }
  0x67   :  { %1445 = vmatpush.bf16.msra.mxu3 %v2595_v13  ;;  %v2787_v13 = vor.u32 %v3120_v63, %v2784_v1  ;;  %v2659_v17 = vor.u32 %v3088_v6, %v2656_v7  ;;  %v2070_v59 = vld [vmem:[#allocation5 + $0x68] sm:$0xf]  ;;  %v2943_v61 = vld [vmem:[#allocation5 + $0x74] sm:$0xf0]  ;;  %v2471_v62 = vor.u32 %v3043_v52, %v2470_v51  ;;  %v2957_v51 = vld [vmem:[#allocation5 + $0xec] sm:$0xf] }
  0x68   :  { %1420 = vmatpush.bf16.msra.mxu0 %v2323_v20  ;;  %v2519_v20 = vor.u32 %v3055_v12, %v2518_v11  ;;  %v2326_v63 = vld [vmem:[#allocation5 + $0x268] sm:$0xf]  ;;  %v3039_v3 = vld [vmem:[#allocation5 + $0x374] sm:$0xf0]  ;;  %v2136_v52 = vld [vmem:[#allocation5 + $0xf8] sm:$0xf0] }
  0x69   :  { %1433 = vmatpush.bf16.msra.mxu1 %v2451_v21  ;;  %v2374_v21 = vld [vmem:[#allocation5 + $0x2c8] sm:$0xf]  ;;  %v2975_v6 = vld [vmem:[#allocation5 + $0x174] sm:$0xf0] }
  0x6a   :  { %1458 = vmatpush.bf16.msrb.mxu2 %v2723_v19  ;;  %v2955_v19 = vld [vmem:[#allocation5 + $0xd4] sm:$0xf0]  ;;  %v2375_v29 = vor.u32 %v3019_v22, %v2374_v21  ;;  %v2454_v2 = vld [vmem:[#allocation5 + $0x368] sm:$0xf] }
  0x6b   :  { %1446 = vmatpush.bf16.msra.mxu3 %v2579_v25  ;;  %v3051_v25 = vld [vmem:[#allocation5 + $0x3d4] sm:$0xf0]  ;;  %v2119_v26 = vor.u32 %v2955_v19, %v2118_v18  ;;  %v2455_v11 = vor.u32 %v3039_v3, %v2454_v2  ;;  %v2310_v12 = vld [vmem:[#allocation5 + $0x248] sm:$0xf]  ;;  %v2139_v3 = vor.u32 %v2957_v51, %v2136_v52 }
  0x6c   :  { %1421 = vmatpush.bf16.msra.mxu0 %v2307_v33  ;;  %v2503_v32 = vor.u32 %v3051_v25, %v2502_v24  ;;  %v2358_v33 = vld [vmem:[#allocation5 + $0x2a8] sm:$0xf]  ;;  %v2971_v19 = vld [vmem:[#allocation5 + $0x154] sm:$0xf0] }
  0x6d   :  { %1434 = vmatpush.bf16.msra.mxu1 %v2435_v35  ;;  %v3015_v35 = vld [vmem:[#allocation5 + $0x2b4] sm:$0xf0]  ;;  %v2438_v15 = vld [vmem:[#allocation5 + $0x348] sm:$0xf] }
  0x6e   :  { %1459 = vmatpush.bf16.msrb.mxu2 %v2707_v31  ;;  %v2951_v31 = vld [vmem:[#allocation5 + $0xb4] sm:$0xf0]  ;;  %v2359_v43 = vor.u32 %v3015_v35, %v2358_v33  ;;  %v2182_v18 = vld [vmem:[#allocation5 + $0x148] sm:$0xf] }
  0x6f   :  { %1447 = vmatpush.bf16.msra.mxu3 %v2563_v40  ;;  %v2103_v40 = vor.u32 %v2951_v31, %v2102_v30  ;;  %v2038_v21 = vld [vmem:[#allocation5 + $0x28] sm:$0xf]  ;;  %v2935_v22 = vld [vmem:[#allocation5 + $0x34] sm:$0xf0] }
  0x70   :  { %1422 = vmatpush.bf16.msra.mxu0 %v2291_v49  ;;  %v3011_v49 = vld [vmem:[#allocation5 + $0x294] sm:$0xf0]  ;;  %v2294_v24 = vld [vmem:[#allocation5 + $0x228] sm:$0xf] }
  0x71   :  { %1435 = vmatpush.bf16.msra.mxu1 %v2419_v50  ;;  %v2231_v50 = vor.u32 %v2983_v42, %v2230_v41  ;;  %v2343_v58 = vor.u32 %v3011_v49, %v2342_v47  ;;  %v2999_v25 = vld [vmem:[#allocation5 + $0x234] sm:$0xf0]  ;;  %v2422_v27 = vld [vmem:[#allocation5 + $0x328] sm:$0xf] }
  0x72   :  { %1460 = vmatpush.bf16.msrb.mxu2 %v2691_v45  ;;  %v2947_v45 = vld [vmem:[#allocation5 + $0x94] sm:$0xf0]  ;;  %v2166_v30 = vld [vmem:[#allocation5 + $0x128] sm:$0xf]  ;;  %v2295_v33 = vor.u32 %v2999_v25, %v2294_v24 }
  0x73   :  { %1448 = vmatpush.bf16.msra.mxu3 %v2547_v55  ;;  %v2087_v54 = vor.u32 %v2947_v45, %v2086_v44  ;;  %v2214_v55 = vld [vmem:[#allocation5 + $0x188] sm:$0xf]  ;;  %v3031_v28 = vld [vmem:[#allocation5 + $0x334] sm:$0xf0] }
  0x74   :  { %1423 = vmatpush.bf16.msra.mxu0 %v2275_v4  ;;  %v2215_v1 = vor.u32 %v2979_v56, %v2214_v55  ;;  %v2071_v4 = vor.u32 %v2943_v61, %v2070_v59  ;;  %v2967_v31 = vld [vmem:[#allocation5 + $0x134] sm:$0xf0]  ;;  %v2423_v38 = vor.u32 %v3031_v28, %v2422_v27  ;;  %v2278_v41 = vld [vmem:[#allocation5 + $0x208] sm:$0xf]  ;;  %v2232_v27 = vld [vmem:[#allocation5 + $0x1b8] sm:$0xf0] }
  0x75   :  { %1436 = vmatpush.bf16.msra.mxu1 %v2403_v5  ;;  %v2198_v5 = vld [vmem:[#allocation5 + $0x168] sm:$0xf]  ;;  %v2931_v35 = vld [vmem:[#allocation5 + $0x14] sm:$0xf0]  ;;  %v2167_v44 = vor.u32 %v2967_v31, %v2166_v30  ;;  %v2945_v30 = vld [vmem:[#allocation5 + $0x8c] sm:$0xf] }
  0x76   :  { %1461 = vmatpush.bf16.msrb.mxu2 %v2675_v0  ;;  %v3007_v0 = vld [vmem:[#allocation5 + $0x274] sm:$0xf0]  ;;  %v2199_v14 = vor.u32 %v2975_v6, %v2198_v5  ;;  %v2774_v56 = vld [vmem:[#allocation5 + $0x5e8] sm:$0xf]  ;;  %v2953_v5 = vld [vmem:[#allocation5 + $0xcc] sm:$0xf] }
  0x77   :  { %1449 = vmatpush.bf16.msra.mxu3 %v2531_v8  ;;  %1424 = vmatmul.bf16.vlgmr.msra.gmra.mxu0 %v3349_v53  ;;  %v2327_v7 = vor.u32 %v3007_v0, %v2326_v63  ;;  %v2054_v8 = vld [vmem:[#allocation5 + $0x48] sm:$0xf]  ;;  %v3087_v37 = vld [vmem:[#allocation5 + $0x4f4] sm:$0xf0]  ;;  %v2989_v0 = vld [vmem:[#allocation5 + $0x1ec] sm:$0xf] }
  0x78   :  { %1507 = vmatpush.bf16.msrb.mxu0 %v2391_v16  ;;  %1437 = vmatmul.bf16.vlgmr.msra.gmra.mxu1 %v3353_v60  ;;  %v3035_v16 = vld [vmem:[#allocation5 + $0x354] sm:$0xf0]  ;;  %v2630_v59 = vld [vmem:[#allocation5 + $0x4c8] sm:$0xf]  ;;  %v2120_v6 = vld [vmem:[#allocation5 + $0xd8] sm:$0xf0] }
  0x79   :  { %1481 = vmatpush.bf16.msrb.mxu1 %v2135_v10  ;;  %v2939_v10 = vld [vmem:[#allocation5 + $0x54] sm:$0xf0]  ;;  %v2598_v24 = vld [vmem:[#allocation5 + $0x488] sm:$0xf]  ;;  %v2088_v31 = vld [vmem:[#allocation5 + $0x98] sm:$0xf0] }
  0x7a   :  { %1462 = vmatpush.bf16.msrb.mxu2 %v2659_v17  ;;  %1450 = vmatmul.bf16.vlgmr.msra.gmra.mxu3 %v3365_v34  ;;  %v2055_v17 = vor.u32 %v2939_v10, %v2054_v8  ;;  %v2995_v42 = vld [vmem:[#allocation5 + $0x214] sm:$0xf0]  ;;  %v2758_v10 = vld [vmem:[#allocation5 + $0x5c8] sm:$0xf] }
  0x7b   :  { %1475 = vmatpush.bf16.msrb.mxu3 %v2787_v13  ;;  %v3003_v13 = vld [vmem:[#allocation5 + $0x254] sm:$0xf0]  ;;  %v2279_v55 = vor.u32 %v2995_v42, %v2278_v41  ;;  %v2216_v41 = vld [vmem:[#allocation5 + $0x198] sm:$0xf0]  ;;  %v2091_v42 = vor.u32 %v2945_v30, %v2088_v31  ;;  %v2566_v51 = vld [vmem:[#allocation5 + $0x448] sm:$0xf] }
  0x7c   :  { %1508 = vmatpush.bf16.msrb.mxu0 %v2375_v29  ;;  %v2039_v29 = vor.u32 %v2935_v22, %v2038_v21  ;;  %v3027_v45 = vld [vmem:[#allocation5 + $0x314] sm:$0xf0]  ;;  %v2742_v22 = vld [vmem:[#allocation5 + $0x5a8] sm:$0xf]  ;;  %v2520_v30 = vld [vmem:[#allocation5 + $0x3f8] sm:$0xf0] }
  0x7d   :  { %1482 = vmatpush.bf16.msrb.mxu1 %v2119_v26  ;;  %1463 = vmatmul.bf16.vlgmr.msrb.gmra.mxu2 %v3367_v39  ;;  %v2183_v26 = vor.u32 %v2971_v19, %v2182_v18  ;;  %v3123_v47 = vld [vmem:[#allocation5 + $0x614] sm:$0xf0]  ;;  %v2949_v18 = vld [vmem:[#allocation5 + $0xac] sm:$0xf]  ;;  %v2104_v19 = vld [vmem:[#allocation5 + $0xb8] sm:$0xf0] }
  0x7e   :  { %1520 = vmatpush.bf16.msra.mxu2 %v2519_v20  ;;  %v2311_v20 = vor.u32 %v3003_v13, %v2310_v12  ;;  %v2614_v12 = vld [vmem:[#allocation5 + $0x4a8] sm:$0xf]  ;;  %v3079_v13 = vld [vmem:[#allocation5 + $0x4b4] sm:$0xf0]  ;;  %v2107_v28 = vor.u32 %v2949_v18, %v2104_v19  ;;  %v2168_v18 = vld [vmem:[#allocation5 + $0x138] sm:$0xf0] }
  0x7f   :  { %1494 = vmatpush.bf16.msra.mxu3 %v2263_v23  ;;  %v2439_v23 = vor.u32 %v3035_v16, %v2438_v15  ;;  %v2248_v15 = vld [vmem:[#allocation5 + $0x1d8] sm:$0xf0]  ;;  %v2123_v16 = vor.u32 %v2953_v5, %v2120_v6  ;;  %v3075_v25 = vld [vmem:[#allocation5 + $0x494] sm:$0xf0] }
  0x80   :  { %1509 = vmatpush.bf16.msrb.mxu0 %v2359_v43  ;;  %v2406_v43 = vld [vmem:[#allocation5 + $0x308] sm:$0xf]  ;;  %v3067_v52 = vld [vmem:[#allocation5 + $0x454] sm:$0xf0]  ;;  %v2184_v5 = vld [vmem:[#allocation5 + $0x158] sm:$0xf0] }
  0x81   :  { %1483 = vmatpush.bf16.msrb.mxu1 %v2103_v40  ;;  %v2150_v40 = vld [vmem:[#allocation5 + $0x108] sm:$0xf]  ;;  %v2407_v61 = vor.u32 %v3027_v45, %v2406_v43  ;;  %v2072_v45 = vld [vmem:[#allocation5 + $0x78] sm:$0xf0] }
  0x82   :  { %1521 = vmatpush.bf16.msra.mxu2 %v2503_v32  ;;  %v2022_v32 = vld [vmem:[#allocation5 + $0x8] sm:$0xf] }
  0x83   :  { %1495 = vmatpush.bf16.msra.mxu3 %v2247_v36  ;;  %v2646_v36 = vld [vmem:[#allocation5 + $0x4e8] sm:$0xf]  ;;  %v2023_v49 = vor.u32 %v2931_v35, %v2022_v32  ;;  %v2599_v32 = vor.u32 %v3075_v25, %v2598_v24  ;;  %v2929_v24 = vld [vmem:[#allocation5 + $0xc] sm:$0xf]  ;;  %v2024_v25 = vld [vmem:[#allocation5 + $0x18] sm:$0xf0] }
  0x84   :  { %1510 = vmatpush.bf16.msrb.mxu0 %v2343_v58  ;;  %v3119_v58 = vld [vmem:[#allocation5 + $0x5f4] sm:$0xf0]  ;;  %v2726_v35 = vld [vmem:[#allocation5 + $0x588] sm:$0xf] }
  0x85   :  { %1484 = vmatpush.bf16.msrb.mxu1 %v2087_v54  ;;  %v2647_v54 = vor.u32 %v3087_v37, %v2646_v36  ;;  %v3107_v36 = vld [vmem:[#allocation5 + $0x594] sm:$0xf0]  ;;  %v2582_v37 = vld [vmem:[#allocation5 + $0x468] sm:$0xf] }
  0x86   :  { %1522 = vmatpush.bf16.msra.mxu2 %v2487_v46  ;;  %v2790_v46 = vld [vmem:[#allocation5 + $0x608] sm:$0xf]  ;;  %v2727_v43 = vor.u32 %v3107_v36, %v2726_v35  ;;  %v3017_v35 = vld [vmem:[#allocation5 + $0x2cc] sm:$0xf]  ;;  %v2027_v36 = vor.u32 %v2929_v24, %v2024_v25 }
  0x87   :  { %1496 = vmatpush.bf16.msra.mxu3 %v2231_v50  ;;  %v2963_v50 = vld [vmem:[#allocation5 + $0x114] sm:$0xf0]  ;;  %v2791_v63 = vor.u32 %v3123_v47, %v2790_v46  ;;  %v3037_v24 = vld [vmem:[#allocation5 + $0x36c] sm:$0xf] }
  0x88   :  { %1511 = vmatpush.bf16.msrb.mxu0 %v2327_v7  ;;  %v2151_v2 = vor.u32 %v2963_v50, %v2150_v40  ;;  %v2977_v40 = vld [vmem:[#allocation5 + $0x18c] sm:$0xf]  ;;  %v3103_v50 = vld [vmem:[#allocation5 + $0x574] sm:$0xf0] }
  0x89   :  { %1485 = vmatpush.bf16.msrb.mxu1 %v2071_v4  ;;  %v2775_v4 = vor.u32 %v3119_v58, %v2774_v56  ;;  %v2219_v47 = vor.u32 %v2977_v40, %v2216_v41  ;;  %v2152_v40 = vld [vmem:[#allocation5 + $0x118] sm:$0xf0] }
  0x8a   :  { %1523 = vmatpush.bf16.msra.mxu2 %v2471_v62  ;;  %2797 = vmatmul.msk.bf16.vlgmr.msrb.gmra.mxu3 %vm1295_vm0, %v3361_v48  ;;  %v3083_v62 = vld [vmem:[#allocation5 + $0x4d4] sm:$0xf0] }
  0x8b   :  { %1497 = vmatpush.bf16.msra.mxu3 %v2215_v1  ;;  %v2264_v1 = vld [vmem:[#allocation5 + $0x1f8] sm:$0xf0]  ;;  %v2631_v7 = vor.u32 %v3083_v62, %v2630_v59  ;;  %v2937_v59 = vld [vmem:[#allocation5 + $0x4c] sm:$0xf]  ;;  %v2567_v62 = vor.u32 %v3067_v52, %v2566_v51 }
  0x8c   :  { %1512 = vmatpush.bf16.msrb.mxu0 %v2311_v20  ;;  %v2267_v8 = vor.u32 %v2989_v0, %v2264_v1  ;;  %v2615_v20 = vor.u32 %v3079_v13, %v2614_v12  ;;  %v2694_v0 = vld [vmem:[#allocation5 + $0x548] sm:$0xf]  ;;  %v3099_v1 = vld [vmem:[#allocation5 + $0x554] sm:$0xf0]  ;;  %v3081_v51 = vld [vmem:[#allocation5 + $0x4cc] sm:$0xf] }
  0x8d   :  { %1486 = vmatpush.bf16.msrb.mxu1 %v2055_v17  ;;  %v2678_v13 = vld [vmem:[#allocation5 + $0x528] sm:$0xf]  ;;  %v2632_v52 = vld [vmem:[#allocation5 + $0x4d8] sm:$0xf0] }
  0x8e   :  { %1524 = vmatpush.bf16.msra.mxu2 %v2455_v11  ;;  %v3115_v11 = vld [vmem:[#allocation5 + $0x5d4] sm:$0xf0] }
  0x8f   :  { %1498 = vmatpush.bf16.msra.mxu3 %v2199_v14  ;;  %v2985_v14 = vld [vmem:[#allocation5 + $0x1cc] sm:$0xf]  ;;  %v2759_v17 = vor.u32 %v3115_v11, %v2758_v10  ;;  %v2040_v10 = vld [vmem:[#allocation5 + $0x38] sm:$0xf0] }
  0x90   :  { %1513 = vmatpush.bf16.msrb.mxu0 %v2295_v33  ;;  %v2251_v21 = vor.u32 %v2985_v14, %v2248_v15  ;;  %v3095_v14 = vld [vmem:[#allocation5 + $0x534] sm:$0xf0]  ;;  %v2534_v15 = vld [vmem:[#allocation5 + $0x408] sm:$0xf] }
  0x91   :  { %1487 = vmatpush.bf16.msrb.mxu1 %v2039_v29 }
  0x92   :  { %1525 = vmatpush.bf16.msra.mxu2 %v2439_v23  ;;  %v3111_v23 = vld [vmem:[#allocation5 + $0x5b4] sm:$0xf0] }
  0x93   :  { %1499 = vmatpush.bf16.msra.mxu3 %v2183_v26  ;;  %v2981_v26 = vld [vmem:[#allocation5 + $0x1ac] sm:$0xf]  ;;  %v2743_v29 = vor.u32 %v3111_v23, %v2742_v22  ;;  %v2679_v22 = vor.u32 %v3095_v14, %v2678_v13  ;;  %v2662_v23 = vld [vmem:[#allocation5 + $0x508] sm:$0xf]  ;;  %v2472_v14 = vld [vmem:[#allocation5 + $0x398] sm:$0xf0] }
  0x94   :  { %1514 = vmatpush.bf16.msrb.mxu0 %v2279_v55  ;;  %v2235_v33 = vor.u32 %v2981_v26, %v2232_v27  ;;  %v2200_v55 = vld [vmem:[#allocation5 + $0x178] sm:$0xf0] }
  0x95   :  { %1488 = vmatpush.bf16.msrb.mxu1 %v2023_v49  ;;  %v2710_v49 = vld [vmem:[#allocation5 + $0x568] sm:$0xf] }
  0x96   :  { %1526 = vmatpush.bf16.msra.mxu2 %v2423_v38  ;;  %v3071_v38 = vld [vmem:[#allocation5 + $0x474] sm:$0xf0]  ;;  %v2711_v58 = vor.u32 %v3103_v50, %v2710_v49  ;;  %v2504_v50 = vld [vmem:[#allocation5 + $0x3d8] sm:$0xf0] }
  0x97   :  { %1500 = vmatpush.bf16.msra.mxu3 %v2167_v44  ;;  %1515 = vmatmul.bf16.vlgmr.msrb.gmra.mxu0 %v3349_v53  ;;  %v2941_v44 = vld [vmem:[#allocation5 + $0x6c] sm:$0xf]  ;;  %v2583_v46 = vor.u32 %v3071_v38, %v2582_v37  ;;  %v2376_v37 = vld [vmem:[#allocation5 + $0x2d8] sm:$0xf0] }
  0x98   :  { %1566 = vmatpush.bf16.msra.mxu0 %v2791_v63  ;;  %1489 = vmatmul.bf16.vlgmr.msrb.gmra.mxu1 %v3351_v57  ;;  %v2075_v56 = vor.u32 %v2941_v44, %v2072_v45  ;;  %v2961_v38 = vld [vmem:[#allocation5 + $0x10c] sm:$0xf] }
  0x99   :  { %1533 = vmatpush.bf16.msra.mxu1 %v2647_v54  ;;  %v2973_v54 = vld [vmem:[#allocation5 + $0x16c] sm:$0xf]  ;;  %v2155_v49 = vor.u32 %v2961_v38, %v2152_v40 }
  0x9a   :  { %1527 = vmatpush.bf16.msra.mxu2 %v2407_v61  ;;  %v2056_v61 = vld [vmem:[#allocation5 + $0x58] sm:$0xf0]  ;;  %v2203_v63 = vor.u32 %v2973_v54, %v2200_v55  ;;  %v3013_v55 = vld [vmem:[#allocation5 + $0x2ac] sm:$0xf] }
  0x9b   :  { %1501 = vmatpush.bf16.msra.mxu3 %v2151_v2  ;;  %v2550_v2 = vld [vmem:[#allocation5 + $0x428] sm:$0xf]  ;;  %v2059_v6 = vor.u32 %v2937_v59, %v2056_v61  ;;  %v2760_v59 = vld [vmem:[#allocation5 + $0x5d8] sm:$0xf0]  ;;  %v3033_v38 = vld [vmem:[#allocation5 + $0x34c] sm:$0xf] }
  0x9c   :  { %1585 = vmatpush.bf16.msrb.mxu0 %v2267_v8  ;;  %v2933_v8 = vld [vmem:[#allocation5 + $0x2c] sm:$0xf] }
  0x9d   :  { %1534 = vmatpush.bf16.msra.mxu1 %v2631_v7  ;;  %1528 = vmatmul.bf16.vlgmr.msra.gmra.mxu2 %v3353_v60  ;;  %v2695_v7 = vor.u32 %v3099_v1, %v2694_v0  ;;  %v2043_v19 = vor.u32 %v2933_v8, %v2040_v10  ;;  %v2488_v1 = vld [vmem:[#allocation5 + $0x3b8] sm:$0xf0] }
  0x9e   :  { %1572 = vmatpush.bf16.msrb.mxu2 %v2139_v3  ;;  %1502 = vmatmul.bf16.vlgmr.msra.gmra.mxu3 %v3357_v9  ;;  %v3063_v3 = vld [vmem:[#allocation5 + $0x434] sm:$0xf0]  ;;  %v2744_v8 = vld [vmem:[#allocation5 + $0x5b8] sm:$0xf0] }
  0x9f   :  { %1546 = vmatpush.bf16.msrb.mxu3 %v2775_v4  ;;  %v2969_v4 = vld [vmem:[#allocation5 + $0x14c] sm:$0xf]  ;;  %v2551_v11 = vor.u32 %v3063_v3, %v2550_v2  ;;  %v2616_v3 = vld [vmem:[#allocation5 + $0x4b8] sm:$0xf0] }
  0xa0   :  { %1586 = vmatpush.bf16.msrb.mxu0 %v2251_v21  ;;  %v2187_v12 = vor.u32 %v2969_v4, %v2184_v5  ;;  %v2392_v21 = vld [vmem:[#allocation5 + $0x2f8] sm:$0xf0]  ;;  %v3077_v2 = vld [vmem:[#allocation5 + $0x4ac] sm:$0xf] }
  0xa1   :  { %1535 = vmatpush.bf16.msra.mxu1 %v2615_v20  ;;  %v3021_v20 = vld [vmem:[#allocation5 + $0x2ec] sm:$0xf] }
  0xa2   :  { %1573 = vmatpush.bf16.msrb.mxu2 %v2123_v16  ;;  %v3059_v16 = vld [vmem:[#allocation5 + $0x414] sm:$0xf0]  ;;  %v2395_v31 = vor.u32 %v3021_v20, %v2392_v21  ;;  %v3009_v5 = vld [vmem:[#allocation5 + $0x28c] sm:$0xf]  ;;  %v2728_v21 = vld [vmem:[#allocation5 + $0x598] sm:$0xf0] }
  0xa3   :  { %1547 = vmatpush.bf16.msrb.mxu3 %v2759_v17  ;;  %v2965_v17 = vld [vmem:[#allocation5 + $0x12c] sm:$0xf]  ;;  %v2535_v26 = vor.u32 %v3059_v16, %v2534_v15  ;;  %v2600_v16 = vld [vmem:[#allocation5 + $0x498] sm:$0xf0] }
  0xa4   :  { %1587 = vmatpush.bf16.msrb.mxu0 %v2235_v33  ;;  %v2171_v27 = vor.u32 %v2965_v17, %v2168_v18  ;;  %v2648_v33 = vld [vmem:[#allocation5 + $0x4f8] sm:$0xf0]  ;;  %v3073_v15 = vld [vmem:[#allocation5 + $0x48c] sm:$0xf] }
  0xa5   :  { %1536 = vmatpush.bf16.msra.mxu1 %v2599_v32  ;;  %v3085_v32 = vld [vmem:[#allocation5 + $0x4ec] sm:$0xf] }
  0xa6   :  { %1574 = vmatpush.bf16.msrb.mxu2 %v2107_v28  ;;  %v3091_v28 = vld [vmem:[#allocation5 + $0x514] sm:$0xf0]  ;;  %v2651_v45 = vor.u32 %v3085_v32, %v2648_v33  ;;  %v3005_v18 = vld [vmem:[#allocation5 + $0x26c] sm:$0xf]  ;;  %v2712_v33 = vld [vmem:[#allocation5 + $0x578] sm:$0xf0] }
  0xa7   :  { %1548 = vmatpush.bf16.msrb.mxu3 %v2743_v29  ;;  %2798 = vmatmul.msk.bf16.vlgmr.msra.gmra.mxu0 %vm1295_vm0, %v3361_v48  ;;  %v3053_v29 = vld [vmem:[#allocation5 + $0x3ec] sm:$0xf]  ;;  %v2663_v41 = vor.u32 %v3091_v28, %v2662_v23  ;;  %v2603_v23 = vor.u32 %v3073_v15, %v2600_v16  ;;  %v2584_v28 = vld [vmem:[#allocation5 + $0x478] sm:$0xf0] }
  0xa8   :  { %1588 = vmatpush.bf16.msrb.mxu0 %v2219_v47  ;;  %v2523_v44 = vor.u32 %v3053_v29, %v2520_v30  ;;  %v2379_v47 = vor.u32 %v3017_v35, %v2376_v37  ;;  %v3001_v30 = vld [vmem:[#allocation5 + $0x24c] sm:$0xf] }
  0xa9   :  { %1537 = vmatpush.bf16.msra.mxu1 %v2583_v46  ;;  %v3049_v46 = vld [vmem:[#allocation5 + $0x3cc] sm:$0xf] }
  0xaa   :  { %1575 = vmatpush.bf16.msrb.mxu2 %v2091_v42  ;;  %v3117_v42 = vld [vmem:[#allocation5 + $0x5ec] sm:$0xf]  ;;  %v2507_v61 = vor.u32 %v3049_v46, %v2504_v50 }
  0xab   :  { %1549 = vmatpush.bf16.msrb.mxu3 %v2727_v43  ;;  %v2776_v43 = vld [vmem:[#allocation5 + $0x5f8] sm:$0xf0]  ;;  %v3101_v32 = vld [vmem:[#allocation5 + $0x56c] sm:$0xf] }
  0xac   :  { %1589 = vmatpush.bf16.msrb.mxu0 %v2203_v63  ;;  %v2779_v54 = vor.u32 %v3117_v42, %v2776_v43  ;;  %v3045_v63 = vld [vmem:[#allocation5 + $0x3ac] sm:$0xf]  ;;  %v2440_v42 = vld [vmem:[#allocation5 + $0x358] sm:$0xf0] }
  0xad   :  { %1538 = vmatpush.bf16.msra.mxu1 %v2567_v62  ;;  %v2635_v62 = vor.u32 %v3081_v51, %v2632_v52  ;;  %v2491_v10 = vor.u32 %v3045_v63, %v2488_v1  ;;  %v3065_v43 = vld [vmem:[#allocation5 + $0x44c] sm:$0xf]  ;;  %v2696_v51 = vld [vmem:[#allocation5 + $0x558] sm:$0xf0]  ;;  %v2443_v52 = vor.u32 %v3033_v38, %v2440_v42 }
  0xae   :  { %1576 = vmatpush.bf16.msrb.mxu2 %v2075_v56  ;;  %v2360_v56 = vld [vmem:[#allocation5 + $0x2b8] sm:$0xf0]  ;;  %v2997_v46 = vld [vmem:[#allocation5 + $0x22c] sm:$0xf] }
  0xaf   :  { %1550 = vmatpush.bf16.msrb.mxu3 %v2711_v58  ;;  %v3113_v58 = vld [vmem:[#allocation5 + $0x5cc] sm:$0xf]  ;;  %v2363_v0 = vor.u32 %v3013_v55, %v2360_v56 }
  0xb0   :  { %1590 = vmatpush.bf16.msrb.mxu0 %v2187_v12  ;;  %v2763_v4 = vor.u32 %v3113_v58, %v2760_v59  ;;  %v3041_v12 = vld [vmem:[#allocation5 + $0x38c] sm:$0xf]  ;;  %v2424_v58 = vld [vmem:[#allocation5 + $0x338] sm:$0xf0] }
  0xb1   :  { %1539 = vmatpush.bf16.msra.mxu1 %v2551_v11  ;;  %v2619_v11 = vor.u32 %v3077_v2, %v2616_v3  ;;  %v3097_v50 = vld [vmem:[#allocation5 + $0x54c] sm:$0xf]  ;;  %v2680_v3 = vld [vmem:[#allocation5 + $0x538] sm:$0xf0] }
  0xb2   :  { %1577 = vmatpush.bf16.msrb.mxu2 %v2059_v6  ;;  %v2344_v6 = vld [vmem:[#allocation5 + $0x298] sm:$0xf0]  ;;  %v3029_v55 = vld [vmem:[#allocation5 + $0x32c] sm:$0xf] }
  0xb3   :  { %1551 = vmatpush.bf16.msrb.mxu3 %v2695_v7  ;;  %v3109_v7 = vld [vmem:[#allocation5 + $0x5ac] sm:$0xf]  ;;  %v2347_v13 = vor.u32 %v3009_v5, %v2344_v6  ;;  %v3389_v20 = vpop.f32.mrf.mxu0  ;;  %v2792_v5 = vld [vmem:[#allocation5 + $0x618] sm:$0xf0] }
  0xb4   :  { %1591 = vmatpush.bf16.msrb.mxu0 %v2171_v27  ;;  %v2747_v17 = vor.u32 %v3109_v7, %v2744_v8  ;;  %v3069_v27 = vld [vmem:[#allocation5 + $0x46c] sm:$0xf]  ;;  %v3391_v29 = vpop.f32.mrf.mxu1  ;;  %v2427_v7 = vor.u32 %v3029_v55, %v2424_v58 }
  0xb5   :  { %1540 = vmatpush.bf16.msra.mxu1 %v2535_v26  ;;  %v2456_v26 = vld [vmem:[#allocation5 + $0x378] sm:$0xf0]  ;;  %v2587_v37 = vor.u32 %v3069_v27, %v2584_v28  ;;  %v3061_v59 = vld [vmem:[#allocation5 + $0x42c] sm:$0xf] }
  0xb6   :  { %1578 = vmatpush.bf16.msrb.mxu2 %v2043_v19  ;;  %v2328_v19 = vld [vmem:[#allocation5 + $0x278] sm:$0xf0]  ;;  %v2993_v63 = vld [vmem:[#allocation5 + $0x20c] sm:$0xf] }
  0xb7   :  { %1552 = vmatpush.bf16.msrb.mxu3 %v2679_v22  ;;  %v2475_v22 = vor.u32 %v3041_v12, %v2472_v14  ;;  %v2331_v25 = vor.u32 %v3005_v18, %v2328_v19  ;;  %v3093_v1 = vld [vmem:[#allocation5 + $0x52c] sm:$0xf]  ;;  %v3139_v28 = vld [vmem:[#allocation8 + $0x78] sm:$0xff] }
  0xb8   :  { %1541 = vmatmul.bf16.vlgmr.msra.gmra.mxu1 %v3365_v34  ;;  %1592 = vmatpush.bf16.msrb.mxu0 %v2155_v49  ;;  %v3025_v12 = vld [vmem:[#allocation5 + $0x30c] sm:$0xf]  ;;  %v2683_v15 = vor.u32 %v3093_v1, %v2680_v3 }
  0xb9   :  { %1598 = vmatpush.bf16.msrb.mxu1 %v2395_v31  ;;  %v2312_v31 = vld [vmem:[#allocation5 + $0x258] sm:$0xf0]  ;;  %v3057_v16 = vld [vmem:[#allocation5 + $0x40c] sm:$0xf] }
  0xba   :  { %1579 = vmatpush.bf16.msrb.mxu2 %v2027_v36  ;;  %v2459_v36 = vor.u32 %v3037_v24, %v2456_v26  ;;  %v2315_v40 = vor.u32 %v3001_v30, %v2312_v31  ;;  %v3089_v19 = vld [vmem:[#allocation5 + $0x50c] sm:$0xf]  ;;  %v3131_v24 = vld [vmem:[#allocation8 + $0x38] sm:$0xff] }
  0xbb   :  { %1553 = vmatpush.bf16.msrb.mxu3 %v2663_v41  ;;  %1593 = vmatmul.bf16.vlgmr.msrb.gmra.mxu0 %v3357_v9  ;;  %v3393_v35 = vpop.f32.mrf.mxu2  ;;  %v1310_v49 = vpop.f32.mrf.mxu0  ;;  %v3137_v38 = vld [vmem:[#allocation8 + $0x68] sm:$0xff] }
  0xbc   :  { %1637 = vmatpush.bf16.msra.mxu0 %v2779_v54  ;;  %v1323_v2 = vpop.f32.mrf.mxu1  ;;  %v3133_v55 = vld [vmem:[#allocation8 + $0x48] sm:$0xff] }
  0xbd   :  { %1599 = vmatpush.bf16.msrb.mxu1 %v2379_v47  ;;  %1580 = vmatmul.bf16.vlgmr.msrb.gmra.mxu2 %v3351_v57  ;;  %v3105_v57 = vld [vmem:[#allocation5 + $0x58c] sm:$0xf]  ;;  %v3395_v41 = vpop.f32.mrf.mxu3  ;;  %v2296_v47 = vld [vmem:[#allocation5 + $0x238] sm:$0xf0] }
  0xbe   :  { %1624 = vmatpush.bf16.msra.mxu2 %v2651_v45  ;;  %1554 = vmatmul.bf16.vlgmr.msrb.gmra.mxu3 %v3367_v39  ;;  %v2731_v9 = vor.u32 %v3105_v57, %v2728_v21  ;;  %v2715_v45 = vor.u32 %v3101_v32, %v2712_v33  ;;  %v2299_v56 = vor.u32 %v2997_v46, %v2296_v47  ;;  %v2664_v57 = vld [vmem:[#allocation5 + $0x518] sm:$0xf0]  ;;  %v3125_v47 = vld [vmem:[#allocation8 + $0x8] sm:$0xff] }
  0xbf   :  { %1611 = vmatpush.bf16.msra.mxu3 %v2523_v44  ;;  %v2568_v44 = vld [vmem:[#allocation5 + $0x458] sm:$0xf0] }
  0xc0   :  { %1638 = vmatpush.bf16.msra.mxu0 %v2763_v4  ;;  %v2571_v54 = vor.u32 %v3065_v43, %v2568_v44  ;;  %v3121_v4 = vld [vmem:[#allocation5 + $0x60c] sm:$0xf]  ;;  %v3135_v46 = vld [vmem:[#allocation8 + $0x58] sm:$0xff] }
  0xc1   :  { %1600 = vmatpush.bf16.msrb.mxu1 %v2363_v0  ;;  %v2280_v0 = vld [vmem:[#allocation5 + $0x218] sm:$0xf0]  ;;  %v2795_v18 = vor.u32 %v3121_v4, %v2792_v5 }
  0xc2   :  { %1625 = vmatpush.bf16.msra.mxu2 %v2635_v62  ;;  %v2699_v62 = vor.u32 %v3097_v50, %v2696_v51  ;;  %v3124_v51 = vld [vmem:[#allocation8] sm:$0xff]  ;;  %v3147_v5 = vld [vmem:[#allocation8 + $0xb8] sm:$0xff] }
  0xc3   :  { %1612 = vmatpush.bf16.msra.mxu3 %v2507_v61  ;;  %v2552_v61 = vld [vmem:[#allocation5 + $0x438] sm:$0xf0]  ;;  %v1336_v6 = vpop.f32.mrf.mxu2 }
  0xc4   :  { %1639 = vmatpush.bf16.msra.mxu0 %v2747_v17  ;;  %v2555_v8 = vor.u32 %v3061_v59, %v2552_v61  ;;  %v2536_v17 = vld [vmem:[#allocation5 + $0x418] sm:$0xf0]  ;;  %v3146_v6 = vld [vmem:[#allocation8 + $0xb0] sm:$0xff] }
  0xc5   :  { %1601 = vmatpush.bf16.msrb.mxu1 %v2347_v13  ;;  %v2408_v13 = vld [vmem:[#allocation5 + $0x318] sm:$0xf0]  ;;  %v1349_v14 = vpop.f32.mrf.mxu3 }
  0xc6   :  { %1626 = vmatpush.bf16.msra.mxu2 %v2619_v11  ;;  %v2283_v11 = vor.u32 %v2993_v63, %v2280_v0 }
  0xc7   :  { %1613 = vmatpush.bf16.msra.mxu3 %v2491_v10  ;;  %v3397_v10 = vld [vmem:[#allocation7] sm:$0xf] }
  0xc8   :  { %1640 = vmatpush.bf16.msra.mxu0 %v2731_v9  ;;  %v283_v21 = vperm.slane %v3397_v10, 0  ;;  %v3130_v9 = vld [vmem:[#allocation8 + $0x30] sm:$0xff]  ;;  %v284_v59 = vperm.slane %v3397_v10, 1 }
  0xc9   :  { %1602 = vmatpush.bf16.msrb.mxu1 %v2331_v25  ;;  %v2667_v25 = vor.u32 %v3089_v19, %v2664_v57  ;;  %v3143_v57 = vld [vmem:[#allocation8 + $0x98] sm:$0xff] }
  0xca   :  { %1627 = vmatpush.bf16.msra.mxu2 %v2603_v23  ;;  %v2539_v23 = vor.u32 %v3057_v16, %v2536_v17  ;;  %v1309_v26 = vadd.f32 %v3389_v20, %v283_v21  ;;  %v3129_v20 = vld [vmem:[#allocation8 + $0x28] sm:$0xff]  ;;  %v3142_v21 = vld [vmem:[#allocation8 + $0x90] sm:$0xff] }
  0xcb   :  { %1614 = vmatpush.bf16.msra.mxu3 %v2475_v22  ;;  %v2411_v22 = vor.u32 %v3025_v12, %v2408_v13  ;;  %v1386_v27 = vpop.f32.mrf.mxu2  ;;  %v3145_v13 = vld [vmem:[#allocation8 + $0xa8] sm:$0xff] }
  0xcc   :  { %1641 = vmatpush.bf16.msra.mxu0 %v2715_v45  ;;  %v1322_v30 = vadd.f32 %v3391_v29, %v1309_v26  ;;  %v3127_v29 = vld [vmem:[#allocation8 + $0x18] sm:$0xff] }
  0xcd   :  { %1603 = vmatpush.bf16.msrb.mxu1 %v2315_v40 }
  0xce   :  { %1628 = vmatpush.bf16.msra.mxu2 %v2587_v37  ;;  %v1335_v32 = vadd.f32 %v3393_v35, %v1322_v30  ;;  %v3128_v37 = vld [vmem:[#allocation8 + $0x20] sm:$0xff]  ;;  %v3126_v35 = vld [vmem:[#allocation8 + $0x10] sm:$0xff] }
  0xcf   :  { %1615 = vmatpush.bf16.msra.mxu3 %v2459_v36  ;;  %v3140_v30 = vld [vmem:[#allocation8 + $0x80] sm:$0xff] }
  0xd0   :  { %1642 = vmatpush.bf16.msra.mxu0 %v2699_v62 }
  0xd1   :  { %1604 = vmatpush.bf16.msrb.mxu1 %v2299_v56  ;;  %v3132_v56 = vld [vmem:[#allocation8 + $0x40] sm:$0xff] }
  0xd2   :  { %1629 = vmatpush.bf16.msra.mxu2 %v2571_v54 }
  0xd3   :  { %1616 = vmatpush.bf16.msra.mxu3 %v2443_v52  ;;  %v1388_v36 = vpop.f32.mrf.mxu2 }
  0xd4   :  { %1643 = vmatpush.bf16.msra.mxu0 %v2683_v15  ;;  %v1360_v31 = vpop.f32.mrf.mxu0  ;;  %v3144_v15 = vld [vmem:[#allocation8 + $0xa0] sm:$0xff] }
  0xd5   :  { %1605 = vmatpush.bf16.msrb.mxu1 %v2283_v11  ;;  %v1373_v33 = vpop.f32.mrf.mxu1 }
  0xd6   :  { %1630 = vmatpush.bf16.msra.mxu2 %v2555_v8 }
  0xd7   :  { %1617 = vmatpush.bf16.msra.mxu3 %v2427_v7 }
  0xd8   :  { %1606 = vmatmul.bf16.vlgmr.msrb.gmra.mxu1 %v3349_v53  ;;  %1644 = vmatpush.bf16.msra.mxu0 %v2667_v25  ;;  %v3138_v53 = vld [vmem:[#allocation8 + $0x70] sm:$0xff]  ;;  %v3141_v25 = vld [vmem:[#allocation8 + $0x88] sm:$0xff] }
  0xd9   :  { %1657 = vmatpush.bf16.msra.mxu1 %v2795_v18 }
  0xda   :  { %1631 = vmatpush.bf16.msra.mxu2 %v2539_v23 }
  0xdb   :  { %1618 = vmatpush.bf16.msra.mxu3 %v2411_v22  ;;  %1645 = vmatmul.bf16.vlgmr.msra.gmra.mxu0 %v3367_v39  ;;  %v3136_v39 = vld [vmem:[#allocation8 + $0x60] sm:$0xff] }
  0xdc   :  { %v1362_v42 = vpop.f32.mrf.mxu0 }
  0xdd   :  { %1944 = vmatpush.bf16.msrb.mxu1 %v3139_v28  ;;  %1632 = vmatmul.bf16.vlgmr.msra.gmra.mxu2 %v3365_v34  ;;  %v1399_v40 = vpop.f32.mrf.mxu3  ;;  %v1375_v43 = vpop.f32.mrf.mxu1 }
  0xde   :  { %1619 = vmatmul.bf16.vlgmr.msra.gmra.mxu3 %v3353_v60  ;;  %v1348_v60 = vadd.f32 %v3395_v41, %v1335_v32  ;;  %v3134_v41 = vld [vmem:[#allocation8 + $0x50] sm:$0xff]  ;;  %v1400_v62 = vadd.f32 %v1399_v40, %v284_v59  ;;  %1957 = vmatpush.bf16.msrb.mxu2 %v3147_v5  ;;  %v286_v59 = vperm.slane %v3397_v10, 3 }
  0xdf   :  { %1931 = vmatpush.bf16.msrb.mxu3 %v3131_v24  ;;  %v3154_v32 = vld [vmem:[#allocation8 + $0xf0] sm:$0xff] }
  0xe0   :  { %v1361_v34 = vadd.f32 %v1360_v31, %v1348_v60  ;;  %v1412_v44 = vpop.f32.mrf.mxu2  ;;  %v3153_v60 = vld [vmem:[#allocation8 + $0xe8] sm:$0xff] }
  0xe1   :  { %1945 = vmatpush.bf16.msrb.mxu1 %v3138_v53  ;;  %v1413_v2 = vadd.f32 %v1412_v44, %v1400_v62 }
  0xe2   :  { %v1374_v45 = vadd.f32 %v1373_v33, %v1361_v34  ;;  %1958 = vmatpush.bf16.msrb.mxu2 %v3146_v6  ;;  %v285_v33 = vperm.slane %v3397_v10, 2  ;;  %v3152_v34 = vld [vmem:[#allocation8 + $0xe0] sm:$0xff] }
  0xe3   :  { %1932 = vmatpush.bf16.msrb.mxu3 %v3130_v9 }
  0xe4   :  { %v1387_v49 = vadd.f32 %v1386_v27, %v1374_v45 }
  0xe5   :  { %1946 = vmatpush.bf16.msrb.mxu1 %v3137_v38  ;;  %v1401_v50 = vpop.f32.mrf.mxu3 }
  0xe6   :  { %v1663_v54 = vmax.f32 %v1387_v49, 0.0  ;;  %1959 = vmatpush.bf16.msrb.mxu2 %v3145_v13 }
  0xe7   :  { %1933 = vmatpush.bf16.msrb.mxu3 %v3129_v20  ;;  %v3155_v20 = vld [vmem:[#allocation8 + $0xf8] sm:$0xff] }
  0xe8   :  { %2799 = vmatmul.msk.bf16.vlgmr.msra.gmra.mxu1 %vm1295_vm0, %v3361_v48  ;;  %v1414_v52 = vpop.f32.mrf.mxu2  ;;  %v1667_v48 = vpack.c.bf16 %v1663_v54, %v1663_v54  ;;  %1970 = vmatpush.bf16.msrb.mxu0 %v3155_v20 }
  0xe9   :  { %1947 = vmatpush.bf16.msrb.mxu1 %v3136_v39  ;;  %v3151_v39 = vld [vmem:[#allocation8 + $0xd8] sm:$0xff] }
  0xea   :  { %1960 = vmatpush.bf16.msrb.mxu2 %v3144_v15 }
  0xeb   :  { %1934 = vmatpush.bf16.msrb.mxu3 %v3128_v37 }
  0xec   :  { %1971 = vmatpush.bf16.msrb.mxu0 %v3154_v32 }
  0xed   :  { %1948 = vmatpush.bf16.msrb.mxu1 %v3135_v46  ;;  %v3150_v46 = vld [vmem:[#allocation8 + $0xd0] sm:$0xff] }
  0xee   :  { %1961 = vmatpush.bf16.msrb.mxu2 %v3143_v57 }
  0xef   :  { %1935 = vmatpush.bf16.msrb.mxu3 %v3127_v29 }
  0xf0   :  { %1972 = vmatpush.bf16.msrb.mxu0 %v3153_v60 }
  0xf1   :  { %1949 = vmatpush.bf16.msrb.mxu1 %v3134_v41 }
  0xf2   :  { %1962 = vmatpush.bf16.msrb.mxu2 %v3142_v21 }
  0xf3   :  { %1936 = vmatpush.bf16.msrb.mxu3 %v3126_v35 }
  0xf4   :  { %v1425_v58 = vpop.f32.mrf.mxu0  ;;  %1973 = vmatpush.bf16.msrb.mxu0 %v3152_v34 }
  0xf5   :  { %1950 = vmatpush.bf16.msrb.mxu1 %v3133_v55  ;;  %v1438_v61 = vpop.f32.mrf.mxu1  ;;  %v1426_v4 = vadd.f32 %v1425_v58, %v1413_v2 }
  0xf6   :  { %1963 = vmatpush.bf16.msrb.mxu2 %v3141_v25 }
  0xf7   :  { %1937 = vmatpush.bf16.msrb.mxu3 %v3125_v47  ;;  %v1439_v8 = vadd.f32 %v1438_v61, %v1426_v4 }
  0xf8   :  { %1974 = vmatpush.bf16.msrb.mxu0 %v3151_v39 }
  0xf9   :  { %1951 = vmatpush.bf16.msrb.mxu1 %v3132_v56 }
  0xfa   :  { %1964 = vmatpush.bf16.msrb.mxu2 %v3140_v30 }
  0xfb   :  { %1938 = vmatpush.bf16.msrb.mxu3 %v3124_v51  ;;  %v3149_v51 = vld [vmem:[#allocation8 + $0xc8] sm:$0xff] }
  0xfc   :  { %v1427_v0 = vpop.f32.mrf.mxu0  ;;  %1975 = vmatpush.bf16.msrb.mxu0 %v3150_v46 }
  0xfd   :  { %v1451_v63 = vpop.f32.mrf.mxu3  ;;  %v1440_v3 = vpop.f32.mrf.mxu1 }
  0xfe   :  { %1939 = vmatmul.bf16.vlgmr.msrb.gmra.mxu3 %v1667_v48  ;;  %v1452_v12 = vadd.f32 %v1451_v63, %v1439_v8  ;;  %v3148_v48 = vld [vmem:[#allocation8 + $0xc0] sm:$0xff] }
 0x100   :  { %v1464_v1 = vpop.f32.mrf.mxu2  ;;  %1976 = vmatpush.bf16.msrb.mxu0 %v3149_v51 }
 0x101   :  { %v1465_v14 = vadd.f32 %v1464_v1, %v1452_v12 }
 0x104   :  { %1977 = vmatpush.bf16.msrb.mxu0 %v3148_v48 }
 0x105   :  { %v1453_v7 = vpop.f32.mrf.mxu3 }
 0x108   :  { %v1466_v11 = vpop.f32.mrf.mxu2 }
 0x10d   :  { %v1477_v16 = vpop.f32.mrf.mxu3 }
 0x10e   :  { %v1478_v17 = vadd.f32 %v1477_v16, %v1465_v14 }
 0x110   :  { %v1664_v18 = vmax.f32 %v1478_v17, 0.0 }
 0x112   :  { %v1668_v19 = vpack.c.bf16 %v1664_v18, %v1664_v18 }
 0x114   :  { %1952 = vmatmul.bf16.vlgmr.msrb.gmra.mxu1 %v1668_v19  ;;  %v1516_v23 = vpop.f32.mrf.mxu0  ;;  %v3165_v19 = vld [vmem:[%s3423_s4] ss:$0 sm:$0xff]  ;;  %s3306_s4 = smov [#allocation10]  }
 0x115   :  { %v1479_v22 = vpop.f32.mrf.mxu3  ;;  %v1490_v24 = vpop.f32.mrf.mxu1  ;;  %s1998_s15 = sshll.u32 %s3306_s4, 4  ;;  %s1999_s15 = int_to_ptr.vmem [resolvable:$true] %s1998_s15 }
 0x116   :  { %v1491_v37 = vadd.f32 %v1490_v24, %v285_v33 }
 0x11c   :  { %v1518_v27 = vpop.f32.mrf.mxu0 }
 0x11d   :  { %v1492_v9 = vpop.f32.mrf.mxu1 }
 0x120   :  { %v1529_v28 = vpop.f32.mrf.mxu2 }
 0x121   :  { %v1503_v26 = vpop.f32.mrf.mxu3 }
 0x122   :  { %v1504_v29 = vadd.f32 %v1503_v26, %v1491_v37 }
 0x124   :  { %v1568_v53 = vpop.f32.mrf.mxu0  ;;  %v1517_v42 = vadd.f32 %v1516_v23, %v1504_v29 }
 0x126   :  { %v1530_v43 = vadd.f32 %v1529_v28, %v1517_v42 }
 0x128   :  { %v1531_v36 = vpop.f32.mrf.mxu2 }
 0x129   :  { %v1505_v31 = vpop.f32.mrf.mxu3 }
 0x12c   :  { %v1570_v38 = vpop.f32.mrf.mxu0 }
 0x135   :  { %v1542_v40 = vpop.f32.mrf.mxu1 }
 0x136   :  { %v1543_v44 = vadd.f32 %v1542_v40, %v1530_v43 }
 0x138   :  { %v1594_v35 = vpop.f32.mrf.mxu0 }
 0x13d   :  { %v1544_v45 = vpop.f32.mrf.mxu1 }
 0x140   :  { %v1581_v49 = vpop.f32.mrf.mxu2  ;;  %v1596_v54 = vpop.f32.mrf.mxu0 }
 0x141   :  { %v1555_v47 = vpop.f32.mrf.mxu3  ;;  %v1582_v61 = vadd.f32 %v1581_v49, %v286_v59 }
 0x142   :  { %v1556_v41 = vadd.f32 %v1555_v47, %v1543_v44 }
 0x143   :  { %v1595_v63 = vadd.f32 %v1594_v35, %v1582_v61 }
 0x144   :  { %v1569_v50 = vadd.f32 %v1568_v53, %v1556_v41 }
 0x146   :  { %v1665_v52 = vmax.f32 %v1569_v50, 0.0 }
 0x148   :  { %v1669_v55 = vpack.c.bf16 %v1665_v52, %v1665_v52  ;;  %v1583_v58 = vpop.f32.mrf.mxu2 }
 0x149   :  { %v1557_v56 = vpop.f32.mrf.mxu3 }
 0x14a   :  { %1965 = vmatmul.bf16.vlgmr.msrb.gmra.mxu2 %v1669_v55 }
 0x155   :  { %v1607_v62 = vpop.f32.mrf.mxu1 }
 0x156   :  { %v1608_v1 = vadd.f32 %v1607_v62, %v1595_v63 }
 0x158   :  { %v1646_v0 = vpop.f32.mrf.mxu0 }
 0x15d   :  { %v1609_v2 = vpop.f32.mrf.mxu1 }
 0x160   :  { %v1633_v5 = vpop.f32.mrf.mxu2  ;;  %v1648_v7 = vpop.f32.mrf.mxu0 }
 0x161   :  { %v1620_v3 = vpop.f32.mrf.mxu3 }
 0x162   :  { %v1621_v4 = vadd.f32 %v1620_v3, %v1608_v1 }
 0x164   :  { %v1634_v6 = vadd.f32 %v1633_v5, %v1621_v4 }
 0x165   :  { %v1659_v11 = vpop.f32.mrf.mxu1 }
 0x166   :  { %v1647_v8 = vadd.f32 %v1646_v0, %v1634_v6 }
 0x168   :  { %v1660_v12 = vadd.f32 %v1659_v11, %v1647_v8  ;;  %v1635_v14 = vpop.f32.mrf.mxu2 }
 0x169   :  { %v1622_v13 = vpop.f32.mrf.mxu3 }
 0x16a   :  { %v1666_v15 = vmax.f32 %v1660_v12, 0.0 }
 0x16c   :  { %v1670_v16 = vpack.c.bf16 %v1666_v15, %v1666_v15 }
 0x16d   :  { %v1661_v10 = vpop.f32.mrf.mxu1 }
 0x16e   :  { %1978 = vmatmul.bf16.vlgmr.msrb.gmra.mxu0 %v1670_v16 }
 0x181   :  { %v1940_v17 = vpop.f32.mrf.mxu3 }
 0x182   :  { %v1941_v57 = vadd.f32 %v3165_v19, %v1940_v17 }
 0x189   :  { %v1942_v18 = vpop.f32.mrf.mxu3 }
 0x191   :  { %v1953_v21 = vpop.f32.mrf.mxu1 }
 0x192   :  { %v1954_v22 = vadd.f32 %v1953_v21, %v1941_v57 }
 0x199   :  { %v1955_v23 = vpop.f32.mrf.mxu1 }
 0x1cd   :  { %v1966_v24 = vpop.f32.mrf.mxu2 }
 0x1ce   :  { %v1967_v26 = vadd.f32 %v1966_v24, %v1954_v22 }
 0x1d5   :  { %v1968_v25 = vpop.f32.mrf.mxu2 }
 0x1eb   :  { %v1979_v27 = vpop.f32.mrf.mxu0 }
 0x1ec   :  { %v1980_v28 = vadd.f32 %v1979_v27, %v1967_v26 }
 0x1ee   :  { %1983 = vmax.xlane.f32.xlu0 %v1980_v28 }
 0x1f3   :  { %v1981_v9 = vpop.f32.mrf.mxu0 }
 0x261   :  { %v1984_v30 = vpop.xlane.xlu0 %1983 }
 0x262   :  { %v1985_v20 = vsub.f32 %v1980_v28, %v1984_v30 }
 0x264   :  { %v1986_v31 = vmul.f32 1.442695, %v1985_v20 }
 0x266   :  { %3166 = vpow2.f32 %v1986_v31 }
 0x26c   :  { %v3167_v53 = vpop.eup %3166 }
 0x26d   :  { %1988 = vadd.xlane.f32.xlu0 %v3167_v53 }
 0x2e0   :  { %v1989_v32 = vpop.xlane.xlu0 %1988 }
 0x2e1   :  { %3168 = vrcp.f32 %v1989_v32 }
 0x2e7   :  { %v3169_v33 = vpop.eup %3168 }
 0x2e8   :  { %v1991_v36 = vmul.f32 %v3169_v33, %v3167_v53 }
 0x2ea   :  { %1992 = vst [vmem:[#allocation10] sm:$0xff] %v1991_v36 }
 0x2eb   :  { %2003 = dma.vmem_to_hbm [thread:$0]  %s1999_s15, 128, %s2001_s18, [#allocation4]  }
 0x2ec   :  { %3296 = dma.done.wait [#allocation4], 128  }
 0x2ed   :  { %3297 = vsyncadd [#allocation4], 4294967168 }
 0x2ee   :  { %2008 = vsyncpa [#allocation3], 1 }
 0x2ef   :  { %2009 = vsyncpa [#allocation6], 1 }
 0x2f0   :  { %2010 = vsyncpa [#allocation9], 1 }
 0x2f1   :  { %2011 = vsyncpa [#allocation4], 1 }

</bundles_post_ra>
